<compile_context>
chip_gen: v7x
topology: tpu7x:2x2x1
jax: 0.10.0
libtpu: 0.0.40
codegen_flags: <defaults>
</compile_context>

<pallas_src>
import functools

import jax
import jax.numpy as jnp
import numpy as np
from jax import lax
from jax.experimental import pallas as pl
from jax.experimental.pallas import tpu as pltpu

LN_EPS = 1e-5


def _round_up(v, m):
    return ((v + m - 1) // m) * m


def _pick_tile(n, g, cap=128):
    """Largest multiple of lcm(8, g) that divides n and is <= cap (else n)."""
    step = int(np.lcm(8, g))
    if step > n or n % step != 0:
        return n                      # single full-extent block (always legal)
    best = step
    cand = step
    while cand <= min(n, cap):
        if n % cand == 0:
            best = cand
        cand += step
    return best


def _odefunc_kernel(xs_ref, xi_ref, beta_ref, gamma_ref, wt_ref, b_ref,
                    m_ref, lnw_ref, lnb_ref, o_ref, *, h_valid):
    wt = wt_ref[...]                   # (Hp, Hp), resident
    bias = b_ref[...]                  # (1, Hp)

    # Linear (y = x @ W^T + b) + ReLU, only for the S and I rows.
    # Padded feature columns of W^T / bias are zero, so padded output lanes
    # stay exactly zero after ReLU.
    S = jnp.maximum(
        jnp.dot(xs_ref[...], wt, preferred_element_type=jnp.float32) + bias, 0.0)
    I = jnp.maximum(
        jnp.dot(xi_ref[...], wt, preferred_element_type=jnp.float32) + bias, 0.0)
    # NOTE: on v6e/v7x the weights could be cast to bf16 (f32 accumulate) for
    # higher MXU throughput at ~1e-2 relative accuracy cost; kept f32 here so
    # the self-test stays tight.

    # scatter_add_ over block_diag(A) COO indices == 0/1 pattern matmul.
    # m_ref holds the tile-local block-diagonal pattern (T, T); tile
    # boundaries are multiples of g, so this is exactly M[tile, tile].
    AI = jnp.dot(m_ref[...], I, preferred_element_type=jnp.float32)

    beta = beta_ref[...]               # (T, 1) -> lane broadcast
    gamma = gamma_ref[...]             # (T, 1)

    dS = -beta * (AI * S)
    gI = gamma * I
    dI = -dS - gI
    dR = gI

    lnw = lnw_ref[...]                 # (1, Hp), zero in padded lanes
    lnb = lnb_ref[...]
    hp = lnw.shape[-1]
    lane = lax.broadcasted_iota(jnp.int32, (1, hp), 1)
    lane_mask = lane < h_valid
    inv_h = 1.0 / float(h_valid)

    def layernorm(v):
        # Padded lanes of v are exactly zero, so the plain sum is the valid sum.
        mu = jnp.sum(v, axis=-1, keepdims=True) * inv_h
        c = v - mu
        var = jnp.sum(jnp.where(lane_mask, c * c, 0.0),
                      axis=-1, keepdims=True) * inv_h
        return c * lax.rsqrt(var + LN_EPS) * lnw + lnb

    # Direct slice stores — no in-kernel concatenate, no params passthrough.
    o_ref[0, :, :] = layernorm(dS)
    o_ref[1, :, :] = layernorm(dI)
    o_ref[2, :, :] = layernorm(dR)


def odefunc_forward(x, w, b, A, ln_w, ln_b):
    """Pallas implementation of ODEfunc.forward(t, x) (t is unused)."""
    x = jnp.asarray(x, jnp.float32)
    N, H = x.shape
    n = N // 4
    g = int(np.shape(A)[0])
    assert N % 4 == 0 and n % g == 0

    Hp = _round_up(H, 128)             # lane-dense feature dim
    T = _pick_tile(n, g)               # node-tile size (multiple of g)
    grid = (n // T,)

    # Tile-local 0/1 block-diagonal sparsity pattern of
    # scipy.sparse.block_diag([A] * (n // g)) — identical for every tile.
    pattern = (np.asarray(A) != 0).astype(np.float32)
    m_tile = jnp.asarray(np.kron(np.eye(T // g, dtype=np.float32), pattern))

    def pad_cols(a):
        return jnp.pad(a, ((0, 0), (0, Hp - a.shape[1]))) if Hp != a.shape[1] else a

    x_S = pad_cols(x[:n])                      # (n, Hp)
    x_I = pad_cols(x[n:2 * n])                 # (n, Hp)  (R input rows unused)
    beta = x[3 * n:, 0:1]                      # (n, 1), extracted in wrapper
    gamma = x[3 * n:, 1:2]                     # (n, 1)

    wt = jnp.asarray(w, jnp.float32).T         # linear is x @ W^T + b
    wt_p = jnp.pad(wt, ((0, Hp - H), (0, Hp - H))) if Hp != H else wt
    b_p = pad_cols(jnp.asarray(b, jnp.float32).reshape(1, H))
    lnw_p = pad_cols(jnp.asarray(ln_w, jnp.float32).reshape(1, H))
    lnb_p = pad_cols(jnp.asarray(ln_b, jnp.float32).reshape(1, H))

    kernel = functools.partial(_odefunc_kernel, h_valid=H)

    out3 = pl.pallas_call(
        kernel,
        out_shape=jax.ShapeDtypeStruct((3, n, Hp), jnp.float32),
        grid=grid,
        in_specs=[
            pl.BlockSpec((T, Hp), lambda t: (t, 0)),    # x_S rows (tiled)
            pl.BlockSpec((T, Hp), lambda t: (t, 0)),    # x_I rows (tiled)
            pl.BlockSpec((T, 1), lambda t: (t, 0)),     # beta
            pl.BlockSpec((T, 1), lambda t: (t, 0)),     # gamma
            pl.BlockSpec((Hp, Hp), lambda t: (0, 0)),   # W^T (resident)
            pl.BlockSpec((1, Hp), lambda t: (0, 0)),    # bias (resident)
            pl.BlockSpec((T, T), lambda t: (0, 0)),     # tile block-diag pattern
            pl.BlockSpec((1, Hp), lambda t: (0, 0)),    # LN weight (resident)
            pl.BlockSpec((1, Hp), lambda t: (0, 0)),    # LN bias (resident)
        ],
        out_specs=pl.BlockSpec((3, T, Hp), lambda t: (0, t, 0)),
        compiler_params=pltpu.CompilerParams(
            dimension_semantics=("parallel",)),
    )(x_S, x_I, beta, gamma, wt_p, b_p, m_tile, lnw_p, lnb_p)

    # Assemble the (4n, H) result: strip lane padding, append the params rows
    # passthrough (pure data movement, never enters the kernel).
    d_all = out3.reshape(3 * n, Hp)[:, :H]
    return jnp.concatenate([d_all, x[3 * n:, :]], axis=0)


def odefunc_ref(x, w, b, A, ln_w, ln_b):
    """Pure-JAX reference mirroring the PyTorch forward."""
    x = jnp.asarray(x, jnp.float32)
    N, H = x.shape
    n = N // 4
    M = jnp.kron(jnp.eye(n // A.shape[0], dtype=x.dtype),
                 (A != 0).astype(x.dtype))
    sir = jnp.maximum(x[:3 * n] @ jnp.asarray(w).T + b, 0.0)
    beta = x[3 * n:, 0][:, None]
    gamma = x[3 * n:, 1][:, None]
    S, I = sir[:n], sir[n:2 * n]
    AI = M @ I
    dS = -beta * (AI * S)
    dI = -dS - gamma * I
    dR = gamma * I

    def ln(v):
        mu = v.mean(-1, keepdims=True)
        var = ((v - mu) ** 2).mean(-1, keepdims=True)
        return (v - mu) / jnp.sqrt(var + LN_EPS) * ln_w + ln_b

    return jnp.concatenate([ln(dS), ln(dI), ln(dR), x[3 * n:]], axis=0)


if __name__ == "__main__":
    key = jax.random.PRNGKey(0)
    k_x, k_w, k_b = jax.random.split(key, 3)

    H = 32           # hidden1
    g = 4            # adjacency A size
    n = 256          # nodes per SIR compartment -> n/g = 64 diagonal blocks
    N = 4 * n        # total rows of x (S, I, R, params); tile T=128 -> grid=(2,)

    A = jnp.array(
        [[0, 1, 0, 1],
         [1, 0, 1, 0],
         [0, 1, 0, 1],
         [1, 0, 1, 0]], dtype=jnp.float32)                  # adjacency (g, g)
    w = jax.random.normal(k_w, (H, H), dtype=jnp.float32)    # linear.weight ~ N(0,1)
    b = 0.01 * jax.random.normal(k_b, (H,), dtype=jnp.float32)
    ln_w = jnp.ones((H,), dtype=jnp.float32)                 # LayerNorm defaults
    ln_b = jnp.zeros((H,), dtype=jnp.float32)

    # Input state: positive S/I/R values, params rows carry beta/gamma.
    x = jnp.abs(jax.random.normal(k_x, (N, H), dtype=jnp.float32))

    out = jax.block_until_ready(odefunc_forward(x, w, b, A, ln_w, ln_b))

    ref = odefunc_ref(x, w, b, A, ln_w, ln_b)
    np.testing.assert_allclose(np.asarray(out), np.asarray(ref),
                               rtol=1e-5, atol=1e-4)

    print("KERNEL_OK")
</pallas_src>

<mosaic_0001>
module attributes {stable_mosaic.version = 11 : i64} {
  func.func @_odefunc_kernel(%arg0: i32, %arg1: memref<128x128xf32, #tpu.memory_space<vmem>>, %arg2: memref<128x128xf32, #tpu.memory_space<vmem>>, %arg3: memref<128x1xf32, #tpu.memory_space<vmem>>, %arg4: memref<128x1xf32, #tpu.memory_space<vmem>>, %arg5: memref<128x128xf32, #tpu.memory_space<vmem>>, %arg6: memref<1x128xf32, #tpu.memory_space<vmem>>, %arg7: memref<128x128xf32, #tpu.memory_space<vmem>>, %arg8: memref<1x128xf32, #tpu.memory_space<vmem>>, %arg9: memref<1x128xf32, #tpu.memory_space<vmem>>, %arg10: memref<3x128x128xf32, #tpu.memory_space<vmem>>) attributes {dimension_semantics = [#tpu.dimension_semantics<parallel>], iteration_bounds = array<i64: 2>, scalar_prefetch = 0 : i64, scratch_operands = 0 : i64, tpu.core_type = #tpu.core_type<tc>, window_params = [{transform_indices = @transform_0, window_bounds = array<i64: 128, 128>}, {transform_indices = @transform_1, window_bounds = array<i64: 128, 128>}, {transform_indices = @transform_2, window_bounds = array<i64: 128, 1>}, {transform_indices = @transform_3, window_bounds = array<i64: 128, 1>}, {pipeline_mode = #tpu.pipeline_mode<synchronous>, transform_indices = @transform_4, window_bounds = array<i64: 128, 128>}, {pipeline_mode = #tpu.pipeline_mode<synchronous>, transform_indices = @transform_5, window_bounds = array<i64: 1, 128>}, {pipeline_mode = #tpu.pipeline_mode<synchronous>, transform_indices = @transform_6, window_bounds = array<i64: 128, 128>}, {pipeline_mode = #tpu.pipeline_mode<synchronous>, transform_indices = @transform_7, window_bounds = array<i64: 1, 128>}, {pipeline_mode = #tpu.pipeline_mode<synchronous>, transform_indices = @transform_8, window_bounds = array<i64: 1, 128>}, {transform_indices = @transform_9, window_bounds = array<i64: 3, 128, 128>}]} {
    %c0 = arith.constant 0 : index
    %c0_0 = arith.constant 0 : index
    %0 = vector.load %arg5[%c0, %c0_0] : memref<128x128xf32, #tpu.memory_space<vmem>>, vector<128x128xf32>
    %c0_1 = arith.constant 0 : index
    %c0_2 = arith.constant 0 : index
    %1 = vector.load %arg6[%c0_1, %c0_2] : memref<1x128xf32, #tpu.memory_space<vmem>>, vector<1x128xf32>
    %c0_3 = arith.constant 0 : index
    %c0_4 = arith.constant 0 : index
    %2 = vector.load %arg1[%c0_3, %c0_4] : memref<128x128xf32, #tpu.memory_space<vmem>>, vector<128x128xf32>
    %cst = arith.constant dense<0.000000e+00> : vector<128x128xf32>
    %3 = tpu.matmul %2, %0, %cst {dimension_numbers = #tpu.dot_dimension_numbers<[1], [0], [0], [1], [0, 0, 1, 1], [], []>} : vector<128x128xf32>, vector<128x128xf32>, vector<128x128xf32> -> vector<128x128xf32>
    %4 = vector.broadcast %1 : vector<1x128xf32> to vector<128x128xf32>
    %5 = arith.addf %3, %4 : vector<128x128xf32>
    %cst_5 = arith.constant 0.000000e+00 : f32
    %6 = vector.broadcast %cst_5 : f32 to vector<128x128xf32>
    %7 = arith.maximumf %5, %6 : vector<128x128xf32>
    %c0_6 = arith.constant 0 : index
    %c0_7 = arith.constant 0 : index
    %8 = vector.load %arg2[%c0_6, %c0_7] : memref<128x128xf32, #tpu.memory_space<vmem>>, vector<128x128xf32>
    %cst_8 = arith.constant dense<0.000000e+00> : vector<128x128xf32>
    %9 = tpu.matmul %8, %0, %cst_8 {dimension_numbers = #tpu.dot_dimension_numbers<[1], [0], [0], [1], [0, 0, 1, 1], [], []>} : vector<128x128xf32>, vector<128x128xf32>, vector<128x128xf32> -> vector<128x128xf32>
    %10 = vector.broadcast %1 : vector<1x128xf32> to vector<128x128xf32>
    %11 = arith.addf %9, %10 : vector<128x128xf32>
    %cst_9 = arith.constant 0.000000e+00 : f32
    %12 = vector.broadcast %cst_9 : f32 to vector<128x128xf32>
    %13 = arith.maximumf %11, %12 : vector<128x128xf32>
    %c0_10 = arith.constant 0 : index
    %c0_11 = arith.constant 0 : index
    %14 = vector.load %arg7[%c0_10, %c0_11] : memref<128x128xf32, #tpu.memory_space<vmem>>, vector<128x128xf32>
    %cst_12 = arith.constant dense<0.000000e+00> : vector<128x128xf32>
    %15 = tpu.matmul %14, %13, %cst_12 {dimension_numbers = #tpu.dot_dimension_numbers<[1], [0], [0], [1], [0, 0, 1, 1], [], []>} : vector<128x128xf32>, vector<128x128xf32>, vector<128x128xf32> -> vector<128x128xf32>
    %c0_13 = arith.constant 0 : index
    %c0_14 = arith.constant 0 : index
    %16 = vector.load %arg3[%c0_13, %c0_14] : memref<128x1xf32, #tpu.memory_space<vmem>>, vector<128x1xf32>
    %c0_15 = arith.constant 0 : index
    %c0_16 = arith.constant 0 : index
    %17 = vector.load %arg4[%c0_15, %c0_16] : memref<128x1xf32, #tpu.memory_space<vmem>>, vector<128x1xf32>
    %cst_17 = arith.constant 0.000000e+00 : f32
    %18 = vector.broadcast %cst_17 : f32 to vector<128x1xf32>
    %19 = arith.subf %18, %16 : vector<128x1xf32>
    %20 = arith.mulf %15, %7 : vector<128x128xf32>
    %21 = vector.broadcast %19 : vector<128x1xf32> to vector<128x128xf32>
    %22 = arith.mulf %21, %20 : vector<128x128xf32>
    %23 = vector.broadcast %17 : vector<128x1xf32> to vector<128x128xf32>
    %24 = arith.mulf %23, %13 : vector<128x128xf32>
    %cst_18 = arith.constant 0.000000e+00 : f32
    %25 = vector.broadcast %cst_18 : f32 to vector<128x128xf32>
    %26 = arith.subf %25, %22 : vector<128x128xf32>
    %27 = arith.subf %26, %24 : vector<128x128xf32>
    %c0_19 = arith.constant 0 : index
    %c0_20 = arith.constant 0 : index
    %28 = vector.load %arg8[%c0_19, %c0_20] : memref<1x128xf32, #tpu.memory_space<vmem>>, vector<1x128xf32>
    %c0_21 = arith.constant 0 : index
    %c0_22 = arith.constant 0 : index
    %29 = vector.load %arg9[%c0_21, %c0_22] : memref<1x128xf32, #tpu.memory_space<vmem>>, vector<1x128xf32>
    %30 = tpu.iota {dimensions = array<i32: 1>} : vector<1x128xi32>
    %c32_i32 = arith.constant 32 : i32
    %31 = vector.broadcast %c32_i32 : i32 to vector<1x128xi32>
    %32 = arith.cmpi slt, %30, %31 : vector<1x128xi32>
    %cst_23 = arith.constant dense<0.000000e+00> : vector<128xf32>
    %33 = vector.multi_reduction <add>, %22, %cst_23 [1] : vector<128x128xf32> to vector<128xf32>
    %34 = vector.shape_cast %33 : vector<128xf32> to vector<128x1xf32>
    %cst_24 = arith.constant 3.125000e-02 : f32
    %35 = vector.broadcast %cst_24 : f32 to vector<128x1xf32>
    %36 = arith.mulf %34, %35 : vector<128x1xf32>
    %37 = vector.broadcast %36 : vector<128x1xf32> to vector<128x128xf32>
    %38 = arith.subf %22, %37 : vector<128x128xf32>
    %39 = arith.mulf %38, %38 : vector<128x128xf32>
    %cst_25 = arith.constant 0.000000e+00 : f32
    %40 = vector.shape_cast %32 : vector<1x128xi1> to vector<1x128xi1>
    %41 = vector.broadcast %40 : vector<1x128xi1> to vector<128x128xi1>
    %42 = vector.broadcast %cst_25 : f32 to vector<128x128xf32>
    %43 = arith.select %41, %39, %42 : vector<128x128xi1>, vector<128x128xf32>
    %cst_26 = arith.constant dense<0.000000e+00> : vector<128xf32>
    %44 = vector.multi_reduction <add>, %43, %cst_26 [1] : vector<128x128xf32> to vector<128xf32>
    %45 = vector.shape_cast %44 : vector<128xf32> to vector<128x1xf32>
    %cst_27 = arith.constant 3.125000e-02 : f32
    %46 = vector.broadcast %cst_27 : f32 to vector<128x1xf32>
    %47 = arith.mulf %45, %46 : vector<128x1xf32>
    %cst_28 = arith.constant 9.99999974E-6 : f32
    %48 = vector.broadcast %cst_28 : f32 to vector<128x1xf32>
    %49 = arith.addf %47, %48 : vector<128x1xf32>
    %50 = math.rsqrt %49 : vector<128x1xf32>
    %51 = vector.broadcast %50 : vector<128x1xf32> to vector<128x128xf32>
    %52 = arith.mulf %38, %51 : vector<128x128xf32>
    %53 = vector.broadcast %28 : vector<1x128xf32> to vector<128x128xf32>
    %54 = arith.mulf %52, %53 : vector<128x128xf32>
    %55 = vector.broadcast %29 : vector<1x128xf32> to vector<128x128xf32>
    %56 = arith.addf %54, %55 : vector<128x128xf32>
    %c0_29 = arith.constant 0 : index
    %c0_30 = arith.constant 0 : index
    %c0_31 = arith.constant 0 : index
    %57 = vector.load %arg10[%c0_29, %c0_30, %c0_31] : memref<3x128x128xf32, #tpu.memory_space<vmem>>, vector<1x128x128xf32>
    %58 = vector.shape_cast %57 : vector<1x128x128xf32> to vector<128x128xf32>
    %59 = vector.shape_cast %56 : vector<128x128xf32> to vector<1x128x128xf32>
    tpu.vector_store %arg10[%c0_29, %c0_30, %c0_31], %59 {strides = array<i32>} : memref<3x128x128xf32, #tpu.memory_space<vmem>>, vector<1x128x128xf32>,
    %cst_32 = arith.constant dense<0.000000e+00> : vector<128xf32>
    %60 = vector.multi_reduction <add>, %27, %cst_32 [1] : vector<128x128xf32> to vector<128xf32>
    %61 = vector.shape_cast %60 : vector<128xf32> to vector<128x1xf32>
    %cst_33 = arith.constant 3.125000e-02 : f32
    %62 = vector.broadcast %cst_33 : f32 to vector<128x1xf32>
    %63 = arith.mulf %61, %62 : vector<128x1xf32>
    %64 = vector.broadcast %63 : vector<128x1xf32> to vector<128x128xf32>
    %65 = arith.subf %27, %64 : vector<128x128xf32>
    %66 = arith.mulf %65, %65 : vector<128x128xf32>
    %cst_34 = arith.constant 0.000000e+00 : f32
    %67 = vector.shape_cast %32 : vector<1x128xi1> to vector<1x128xi1>
    %68 = vector.broadcast %67 : vector<1x128xi1> to vector<128x128xi1>
    %69 = vector.broadcast %cst_34 : f32 to vector<128x128xf32>
    %70 = arith.select %68, %66, %69 : vector<128x128xi1>, vector<128x128xf32>
    %cst_35 = arith.constant dense<0.000000e+00> : vector<128xf32>
    %71 = vector.multi_reduction <add>, %70, %cst_35 [1] : vector<128x128xf32> to vector<128xf32>
    %72 = vector.shape_cast %71 : vector<128xf32> to vector<128x1xf32>
    %cst_36 = arith.constant 3.125000e-02 : f32
    %73 = vector.broadcast %cst_36 : f32 to vector<128x1xf32>
    %74 = arith.mulf %72, %73 : vector<128x1xf32>
    %cst_37 = arith.constant 9.99999974E-6 : f32
    %75 = vector.broadcast %cst_37 : f32 to vector<128x1xf32>
    %76 = arith.addf %74, %75 : vector<128x1xf32>
    %77 = math.rsqrt %76 : vector<128x1xf32>
    %78 = vector.broadcast %77 : vector<128x1xf32> to vector<128x128xf32>
    %79 = arith.mulf %65, %78 : vector<128x128xf32>
    %80 = vector.broadcast %28 : vector<1x128xf32> to vector<128x128xf32>
    %81 = arith.mulf %79, %80 : vector<128x128xf32>
    %82 = vector.broadcast %29 : vector<1x128xf32> to vector<128x128xf32>
    %83 = arith.addf %81, %82 : vector<128x128xf32>
    %c1 = arith.constant 1 : index
    %c0_38 = arith.constant 0 : index
    %c0_39 = arith.constant 0 : index
    %84 = vector.load %arg10[%c1, %c0_38, %c0_39] : memref<3x128x128xf32, #tpu.memory_space<vmem>>, vector<1x128x128xf32>
    %85 = vector.shape_cast %84 : vector<1x128x128xf32> to vector<128x128xf32>
    %86 = vector.shape_cast %83 : vector<128x128xf32> to vector<1x128x128xf32>
    tpu.vector_store %arg10[%c1, %c0_38, %c0_39], %86 {strides = array<i32>} : memref<3x128x128xf32, #tpu.memory_space<vmem>>, vector<1x128x128xf32>,
    %cst_40 = arith.constant dense<0.000000e+00> : vector<128xf32>
    %87 = vector.multi_reduction <add>, %24, %cst_40 [1] : vector<128x128xf32> to vector<128xf32>
    %88 = vector.shape_cast %87 : vector<128xf32> to vector<128x1xf32>
    %cst_41 = arith.constant 3.125000e-02 : f32
    %89 = vector.broadcast %cst_41 : f32 to vector<128x1xf32>
    %90 = arith.mulf %88, %89 : vector<128x1xf32>
    %91 = vector.broadcast %90 : vector<128x1xf32> to vector<128x128xf32>
    %92 = arith.subf %24, %91 : vector<128x128xf32>
    %93 = arith.mulf %92, %92 : vector<128x128xf32>
    %cst_42 = arith.constant 0.000000e+00 : f32
    %94 = vector.shape_cast %32 : vector<1x128xi1> to vector<1x128xi1>
    %95 = vector.broadcast %94 : vector<1x128xi1> to vector<128x128xi1>
    %96 = vector.broadcast %cst_42 : f32 to vector<128x128xf32>
    %97 = arith.select %95, %93, %96 : vector<128x128xi1>, vector<128x128xf32>
    %cst_43 = arith.constant dense<0.000000e+00> : vector<128xf32>
    %98 = vector.multi_reduction <add>, %97, %cst_43 [1] : vector<128x128xf32> to vector<128xf32>
    %99 = vector.shape_cast %98 : vector<128xf32> to vector<128x1xf32>
    %cst_44 = arith.constant 3.125000e-02 : f32
    %100 = vector.broadcast %cst_44 : f32 to vector<128x1xf32>
    %101 = arith.mulf %99, %100 : vector<128x1xf32>
    %cst_45 = arith.constant 9.99999974E-6 : f32
    %102 = vector.broadcast %cst_45 : f32 to vector<128x1xf32>
    %103 = arith.addf %101, %102 : vector<128x1xf32>
    %104 = math.rsqrt %103 : vector<128x1xf32>
    %105 = vector.broadcast %104 : vector<128x1xf32> to vector<128x128xf32>
    %106 = arith.mulf %92, %105 : vector<128x128xf32>
    %107 = vector.broadcast %28 : vector<1x128xf32> to vector<128x128xf32>
    %108 = arith.mulf %106, %107 : vector<128x128xf32>
    %109 = vector.broadcast %29 : vector<1x128xf32> to vector<128x128xf32>
    %110 = arith.addf %108, %109 : vector<128x128xf32>
    %c2 = arith.constant 2 : index
    %c0_46 = arith.constant 0 : index
    %c0_47 = arith.constant 0 : index
    %111 = vector.load %arg10[%c2, %c0_46, %c0_47] : memref<3x128x128xf32, #tpu.memory_space<vmem>>, vector<1x128x128xf32>
    %112 = vector.shape_cast %111 : vector<1x128x128xf32> to vector<128x128xf32>
    %113 = vector.shape_cast %110 : vector<128x128xf32> to vector<1x128x128xf32>
    tpu.vector_store %arg10[%c2, %c0_46, %c0_47], %113 {strides = array<i32>} : memref<3x128x128xf32, #tpu.memory_space<vmem>>, vector<1x128x128xf32>,
    return
  }
  func.func @transform_0(%arg0: i32) -> (i32, i32) {
    %c0_i32 = arith.constant 0 : i32
    %c0_i32_0 = arith.constant 0 : i32
    return %arg0, %c0_i32 : i32, i32
  }
  func.func @transform_1(%arg0: i32) -> (i32, i32) {
    %c0_i32 = arith.constant 0 : i32
    %c0_i32_0 = arith.constant 0 : i32
    return %arg0, %c0_i32 : i32, i32
  }
  func.func @transform_2(%arg0: i32) -> (i32, i32) {
    %c0_i32 = arith.constant 0 : i32
    %c0_i32_0 = arith.constant 0 : i32
    return %arg0, %c0_i32 : i32, i32
  }
  func.func @transform_3(%arg0: i32) -> (i32, i32) {
    %c0_i32 = arith.constant 0 : i32
    %c0_i32_0 = arith.constant 0 : i32
    return %arg0, %c0_i32 : i32, i32
  }
  func.func @transform_4(%arg0: i32) -> (i32, i32) {
    %c0_i32 = arith.constant 0 : i32
    %c0_i32_0 = arith.constant 0 : i32
    %c0_i32_1 = arith.constant 0 : i32
    return %c0_i32, %c0_i32_0 : i32, i32
  }
  func.func @transform_5(%arg0: i32) -> (i32, i32) {
    %c0_i32 = arith.constant 0 : i32
    %c0_i32_0 = arith.constant 0 : i32
    %c0_i32_1 = arith.constant 0 : i32
    return %c0_i32, %c0_i32_0 : i32, i32
  }
  func.func @transform_6(%arg0: i32) -> (i32, i32) {
    %c0_i32 = arith.constant 0 : i32
    %c0_i32_0 = arith.constant 0 : i32
    %c0_i32_1 = arith.constant 0 : i32
    return %c0_i32, %c0_i32_0 : i32, i32
  }
  func.func @transform_7(%arg0: i32) -> (i32, i32) {
    %c0_i32 = arith.constant 0 : i32
    %c0_i32_0 = arith.constant 0 : i32
    %c0_i32_1 = arith.constant 0 : i32
    return %c0_i32, %c0_i32_0 : i32, i32
  }
  func.func @transform_8(%arg0: i32) -> (i32, i32) {
    %c0_i32 = arith.constant 0 : i32
    %c0_i32_0 = arith.constant 0 : i32
    %c0_i32_1 = arith.constant 0 : i32
    return %c0_i32, %c0_i32_0 : i32, i32
  }
  func.func @transform_9(%arg0: i32) -> (i32, i32, i32) {
    %c0_i32 = arith.constant 0 : i32
    %c0_i32_0 = arith.constant 0 : i32
    %c0_i32_1 = arith.constant 0 : i32
    return %c0_i32, %arg0, %c0_i32_0 : i32, i32, i32
  }
}

</mosaic_0001>

<bundles_post_ra>
// kernel: tpu_custom_call.1
= control target key start
LH: loop header
LB: loop body
LE: loop exit
PB: predicated region body
PF: predicated region fallthrough
CT: control target
= control target key end

     0   :  { %14 = vsyncpa [#allocation3], 0  ;;  %s4057_s0 = inlined_call_operand.vmem [shape: f32[256,128], index: 0, kind: input, shape index: {}]   ;;  %s4058_s1 = inlined_call_operand.vmem [shape: f32[256,128], index: 1, kind: input, shape index: {}]   ;;  %s4059_s2 = inlined_call_operand.vmem [shape: f32[256,1], index: 2, kind: input, shape index: {}]   ;;  %s4060_s3 = inlined_call_operand.vmem [shape: f32[256,1], index: 3, kind: input, shape index: {}]   ;;  %s4061_s4 = inlined_call_operand.hbm [shape: f32[128,128], index: 4, kind: input, shape index: {}]   ;;  %s4062_s5 = inlined_call_operand.vmem [shape: f32[1,128], index: 5, kind: input, shape index: {}]   ;;  %s4063_s6 = inlined_call_operand.hbm [shape: f32[128,128], index: 6, kind: input, shape index: {}]   ;;  %s4064_s7 = inlined_call_operand.vmem [shape: f32[1,128], index: 7, kind: input, shape index: {}]   ;;  %s4065_s8 = inlined_call_operand.vmem [shape: f32[1,128], index: 8, kind: input, shape index: {}]   ;;  %s4066_s9 = inlined_call_operand.hbm [shape: f32[3,256,128], index: 9, kind: output, shape index: {}]  }
   0x1   :  { %15 = vsyncpa [#allocation6], 0 }
   0x2   :  { %16 = vsyncpa [#allocation4], 0 }
   0x3   :  { %18 = vsyncpa [#allocation4 + $0x1], 0  ;;  %s2931_s30 = smov 0   ;;  %s2933_s10 = smov 0  }
   0x4   :  { %s2935_s11 = smov 0   ;;  %s2937_s12 = smov 0  }
   0x5 LB: > { %4083 = sst [smem:[#allocation13_spill]] %s2863_s11  ;;  %s2952_s13 = sadd.s32 4294967295, %s2867_s12   ;;  %s2867_s12 = sphi %s2937_s12, %s4115_s12   ;;  %s2863_s11 = sphi %s2935_s11, %s4117_s11   ;;  %s2859_s10 = sphi %s2933_s10, %s4119_s10   ;;  %s2855_s30 = sphi %s2931_s30, %s4118_s30  }
   0x6   : > { %s2160_s14 = sadd.s32 4294967294, %s2867_s12   ;;  %s2956_s15 = sadd.s32 1, %s2867_s12  }
   0x7   : > { %4084 = sst [smem:[#allocation14_spill]] %s2956_s15  ;;  %s240_s16 = sadd.s32 1, %s2863_s11 }
   0x8   : > { %s237_s17 = ssub.s32 %s2867_s12, %s2956_s15  ;;  %p250_p0 = scmp.ne.s32.totalorder %s2863_s11, %s2859_s10 }
   0x9   : > { %p238_p1 = scmp.eq.s32.totalorder %s237_s17, 0  ;;  %p251_p2 = scmp.eq.s32.totalorder %s2952_s13, 1 }
   0xa   : > { %p256_p3 = scmp.ne.s32.totalorder %s2859_s10, %s2855_s30  ;;  %p257_p4 = scmp.eq.s32.totalorder %s2160_s14, 1 }
   0xb   : > { %s2967_s18 = scalar_select %p238_p1, %s2863_s11, %s240_s16  }
   0xc   : > { %p2969_p5 = por %p251_p2, %p250_p0  ;;  %p2973_p6 = por %p257_p4, %p256_p3 }
   0xd   : > { %4085 = sst [smem:[#allocation15_spill]] %s2967_s18  ;;  %p2161_p7 = scmp.ge.s32.totalorder %s2867_s12, 1 }
   0xe   : > { %s4086_s19 = scalar_select %p2969_p5, 1, 0 }
   0xf   : > { %s4087_s20 = scalar_select %p2973_p6, 1, 0 }
  0x10   : > { %p264_p8 = scmp.lt.s32.totalorder %s2867_s12, 3  ;;  %p4067_p9 = scmp.eq.s32.totalorder %s2952_s13, 0 }
  0x11   : > { %s2869_s22 = smov [#allocation2]   ;;  %s2870_s25 = smov [#allocation5]  }
  0x12   : > { %p2980_p10 = pnand %p2161_p7, %p264_p8  ;;  %s276_s23 = sshll.u32 %s2869_s22, 4  ;;  %s277_s23 = int_to_ptr.vmem [resolvable:$true] %s276_s23 }
  0x13   : > { %s292_s26 = sshll.u32 %s2870_s25, 4  ;;  %s2769_s29 = scalar_lea.hbm %s4061_s4, 2048  ;;  %s2992_s26 = int_to_ptr.vmem [resolvable:$true] %s292_s26 }
  0x14   : > { %s4088_s21 = scalar_select %p2980_p10, 1, 0 }
  0x15   : > { %p2609_p11 = pneg %p2980_p10  ;;  %p2770_p13 = scmp.ne.s32.totalorder %s4061_s4, %s2769_s29 }
  0x16   : > { %p2776_p3 = scmp.lt.u32.totalorder %s2769_s29, %s4061_s4 }
  0x17   : > { %p2988_p12 = pnand %p4067_p9, %p2609_p11 }
  0x19   : > { %p2771_p0 = pneg %p2988_p12 }
  0x1b   : > { %p2772_p1 = pnand %p2771_p0, %p2770_p13 }
  0x1d   : > { %p2773_p2 = pneg %p2772_p1 }
  0x1f   : > { %p2778_p4 = pnand %p2776_p3, %p2773_p2 }
  0x21   : > { %2781 = shalt.err (!%p2778_p4)
}
  0x22   : > { %s2782_s25 = scalar_lea.vmem %s277_s23, 2048  ;;  %p2790_p9 = scmp.lt.s32.totalorder %s277_s23, %s277_s23 }
  0x23   : > { %p2783_p7 = scmp.ne.s32.totalorder %s277_s23, %s2782_s25  ;;  %p2791_p6 = scmp.lt.s32.totalorder %s2782_s25, %s2782_s25 }
  0x25   : > { %p2785_p8 = pnand %p2783_p7, %p2771_p0  ;;  %p2792_p5 = por %p2791_p6, %p2790_p9 }
  0x27   : > { %p2786_p11 = pneg %p2785_p8 }
  0x29   : > { %p2793_p10 = pnand %p2792_p5, %p2786_p11 }
  0x2b   : > { %2796 = shalt.err (!%p2793_p10)
}
  0x2c   : > { %s2871_s27 = smov 128   ;;  %s2872_s28 = smov 8  }
  0x2d   : > { %2612 = dma.hbm_to_vmem [thread:$0]  (!%p2988_p12), %s4061_s4, 2048, %s277_s23, [#allocation3], %s2871_s27, %s2871_s27, %s2872_s28  }
  0x2e   : > { %s2797_s22 = scalar_lea.hbm %s4063_s6, 2048 }
  0x2f   : > { %p2798_p13 = scmp.ne.s32.totalorder %s4063_s6, %s2797_s22  ;;  %p2804_p9 = scmp.lt.u32.totalorder %s2797_s22, %s4063_s6 }
  0x31   : > { %p2800_p5 = pnand %p2798_p13, %p2771_p0 }
  0x33   : > { %p2801_p6 = pneg %p2800_p5 }
  0x35   : > { %p2806_p10 = pnand %p2804_p9, %p2801_p6 }
  0x37   : > { %2809 = shalt.err (!%p2806_p10)
}
  0x38   : > { %s2810_s23 = scalar_lea.vmem %s2992_s26, 2048  ;;  %p2818_p4 = scmp.lt.s32.totalorder %s2992_s26, %s2992_s26 }
  0x39   : > { %p2811_p1 = scmp.ne.s32.totalorder %s2992_s26, %s2810_s23  ;;  %p2819_p7 = scmp.lt.s32.totalorder %s2810_s23, %s2810_s23 }
  0x3b   : > { %p2813_p2 = pnand %p2811_p1, %p2771_p0  ;;  %p2820_p8 = por %p2819_p7, %p2818_p4 }
  0x3d   : > { %p2814_p3 = pneg %p2813_p2 }
  0x3f   : > { %p2821_p11 = pnand %p2820_p8, %p2814_p3 }
  0x41   : > { %2824 = shalt.err (!%p2821_p11)
}
  0x42   : > { %2615 = dma.hbm_to_vmem [thread:$0]  (!%p2988_p12), %s4063_s6, 2048, %s2992_s26, [#allocation6], %s2871_s27, %s2871_s27, %s2872_s28  }
  0x43   : > { %p4090_p13 = scmp.ne.s32.totalorder %s4088_s21, 0 }
  0x45   : > { %350 = sbr.rel (%p4090_p13) target bundleno = 991 (0x3df), region = 56 }
  0x4c   : > { %p4091_p5 = scmp.eq.s32.totalorder %s2952_s13, 0 }
  0x4e   : > { %2842 = dma.done.wait (%p4091_p5), [#allocation3], 2048   ;;  %p4092_p0 = pmov %p4091_p5 }
  0x50   : > { %2844 = vsyncadd (%p4092_p0), [#allocation3], 4294965248  ;;  %p4093_p6 = pmov %p4092_p0 }
  0x51   : > { %p4094_p9 = pmov %p4092_p0 }
  0x52   : > { %2846 = dma.done.wait (%p4093_p6), [#allocation6], 2048  }
  0x53   : > { %2848 = vsyncadd (%p4094_p9), [#allocation6], 4294965248  ;;  %s2168_s18 = sshll.u32 %s2952_s13, 4  ;;  %v2873_v0 = vmov 0   ;;  %v430_v1 = vld [vmem:[#allocation2] sm:$0xff]  ;;  %v431_v2 = vld [vmem:[#allocation2 + $0x8] sm:$0xff] }
  0x54   : > { %p406_p10 = scmp.lt.s32.totalorder %s2168_s18, 31  ;;  %2670 = vset.pattern.permute.xlu1 %v2873_v0  ;;  %2669 = vset.pattern.permute.xlu0 %v2873_v0  ;;  %v432_v3 = vld [vmem:[#allocation2 + $0x10] sm:$0xff]  ;;  %v2480_v4 = vpack.c.bf16 %v431_v2, %v430_v1  ;;  %v433_v5 = vld [vmem:[#allocation2 + $0x18] sm:$0xff]  ;;  %v434_v7 = vld [vmem:[#allocation2 + $0x20] sm:$0xff] }
  0x55   : > { %v2484_v6 = vpack.c.bf16 %v433_v5, %v432_v3  ;;  %v435_v8 = vld [vmem:[#allocation2 + $0x28] sm:$0xff]  ;;  %v436_v11 = vld [vmem:[#allocation2 + $0x30] sm:$0xff]  ;;  %v437_v12 = vld [vmem:[#allocation2 + $0x38] sm:$0xff] }
  0x56   : > { %s4121_s18 = smov (!%p406_p10, %s2168_s18), 31  ;;  %2513 = vmatprep.subr.bf16.mxu1 %v2480_v4  ;;  %2481 = vmatprep.subr.bf16.mxu0 %v2480_v4  ;;  %v2488_v9 = vpack.c.bf16 %v435_v8, %v434_v7  ;;  %v2492_v13 = vpack.c.bf16 %v437_v12, %v436_v11  ;;  %v438_v14 = vld [vmem:[#allocation2 + $0x40] sm:$0xff]  ;;  %v439_v15 = vld [vmem:[#allocation2 + $0x48] sm:$0xff]  ;;  %v440_v24 = vld [vmem:[#allocation2 + $0x50] sm:$0xff] }
  0x57   : > { %s3052_s21 = sshll.u32 %s4121_s18, 3  ;;  %2515 = vmatpush3.bf16.msra.mxu1 %v2480_v4  ;;  %2483 = vmatpush3.bf16.msra.mxu0 %v2480_v4  ;;  %v2496_v22 = vpack.c.bf16 %v439_v15, %v438_v14  ;;  %v441_v25 = vld [vmem:[#allocation2 + $0x58] sm:$0xff]  ;;  %v442_v31 = vld [vmem:[#allocation2 + $0x60] sm:$0xff]  ;;  %v443_v32 = vld [vmem:[#allocation2 + $0x68] sm:$0xff] }
  0x58   : > { %s3058_s27 = scalar_lea.vmem %s4058_s1, %s3052_s21  ;;  %2517 = vmatprep.subr.bf16.mxu1 %v2484_v6  ;;  %2485 = vmatprep.subr.bf16.mxu0 %v2484_v6  ;;  %s3065_s14 = scalar_lea.vmem %s4059_s2, %s3052_s21  ;;  %v2500_v29 = vpack.c.bf16 %v441_v25, %v440_v24  ;;  %v2504_v36 = vpack.c.bf16 %v443_v32, %v442_v31  ;;  %v444_v38 = vld [vmem:[#allocation2 + $0x70] sm:$0xff]  ;;  %v445_v39 = vld [vmem:[#allocation2 + $0x78] sm:$0xff] }
  0x59   : > { %v630_v10 = vld [vmem:[%s3058_s27] sm:$0xff]  ;;  %v970_v16 = vld [vmem:[%s3065_s14 + $0x10] sm:$0xff]  ;;  %v971_v19 = vld [vmem:[%s3065_s14 + $0x18] sm:$0xff]  ;;  %v2508_v43 = vpack.c.bf16 %v445_v39, %v444_v38  ;;  %s3091_s22 = scalar_lea.vmem %s4060_s3, %s3052_s21  ;;  %s3124_s11 = scalar_lea.vmem %s4057_s0, %s3052_s21 }
  0x5a   : > { %2400 = vmatprep.mubr.f32.mxu1 %v630_v10  ;;  %v1002_v17 = vsub.f32 0.0, %v970_v16  ;;  %v968_v18 = vld [vmem:[%s3065_s14] sm:$0xff]  ;;  %v969_v20 = vld [vmem:[%s3065_s14 + $0x8] sm:$0xff]  ;;  %v1003_v23 = vsub.f32 0.0, %v971_v19  ;;  %v975_v34 = vld [vmem:[%s3065_s14 + $0x38] sm:$0xff]  ;;  %s402_s21 = sand.u32 1, %s2859_s10  }
  0x5b   : > { %2519 = vmatpush3.bf16.msra.mxu1 %v2484_v6  ;;  %2487 = vmatpush3.bf16.msra.mxu0 %v2484_v6  ;;  %v1000_v21 = vsub.f32 0.0, %v968_v18  ;;  %v1001_v26 = vsub.f32 0.0, %v969_v20  ;;  %v973_v27 = vld [vmem:[%s3065_s14 + $0x28] sm:$0xff]  ;;  %v972_v28 = vld [vmem:[%s3065_s14 + $0x20] sm:$0xff]  ;;  %v974_v35 = vld [vmem:[%s3065_s14 + $0x30] sm:$0xff]  ;;  %v1007_v37 = vsub.f32 0.0, %v975_v34 }
  0x5c   : > { %2521 = vmatprep.subr.bf16.mxu1 %v2488_v9  ;;  %2489 = vmatprep.subr.bf16.mxu0 %v2488_v9  ;;  %v1005_v30 = vsub.f32 0.0, %v973_v27  ;;  %v1004_v33 = vsub.f32 0.0, %v972_v28  ;;  %v1006_v40 = vsub.f32 0.0, %v974_v35  ;;  %v977_v41 = vld [vmem:[%s3065_s14 + $0x48] sm:$0xff]  ;;  %v976_v42 = vld [vmem:[%s3065_s14 + $0x40] sm:$0xff]  ;;  %v979_v46 = vld [vmem:[%s3065_s14 + $0x58] sm:$0xff] }
  0x5d   : > { %1044 = vperm.xlu1 %2670, %v1002_v17   ;;  %1034 = vperm.xlu0 %2669, %v1000_v21   ;;  %v1009_v44 = vsub.f32 0.0, %v977_v41  ;;  %v1008_v45 = vsub.f32 0.0, %v976_v42  ;;  %v978_v47 = vld [vmem:[%s3065_s14 + $0x50] sm:$0xff]  ;;  %v1011_v48 = vsub.f32 0.0, %v979_v46  ;;  %v981_v50 = vld [vmem:[%s3065_s14 + $0x68] sm:$0xff]  ;;  %v980_v51 = vld [vmem:[%s3065_s14 + $0x60] sm:$0xff] }
  0x5e   : > { %v1010_v49 = vsub.f32 0.0, %v978_v47  ;;  %v631_v52 = vld [vmem:[%s3058_s27 + $0x8] sm:$0xff]  ;;  %v632_v53 = vld [vmem:[%s3058_s27 + $0x10] sm:$0xff]  ;;  %v1013_v54 = vsub.f32 0.0, %v981_v50  ;;  %v1012_v55 = vsub.f32 0.0, %v980_v51  ;;  %v983_v56 = vld [vmem:[%s3065_s14 + $0x78] sm:$0xff] }
  0x5f   : > { %2523 = vmatpush3.bf16.msra.mxu1 %v2488_v9  ;;  %2491 = vmatpush3.bf16.msra.mxu0 %v2488_v9  ;;  %v982_v57 = vld [vmem:[%s3065_s14 + $0x70] sm:$0xff]  ;;  %v633_v58 = vld [vmem:[%s3058_s27 + $0x18] sm:$0xff]  ;;  %v634_v59 = vld [vmem:[%s3058_s27 + $0x20] sm:$0xff]  ;;  %v1015_v60 = vsub.f32 0.0, %v983_v56  ;;  %s2592_s24 = smul.u32 384, %s402_s21  ;;  %s1998_s23 = scalar_lea.sflag [#allocation4], %s402_s21 }
  0x60   : > { %2525 = vmatprep.subr.bf16.mxu1 %v2492_v13  ;;  %2493 = vmatprep.subr.bf16.mxu0 %v2492_v13  ;;  %v1014_v61 = vsub.f32 0.0, %v982_v57  ;;  %v635_v62 = vld [vmem:[%s3058_s27 + $0x28] sm:$0xff]  ;;  %v636_v63 = vld [vmem:[%s3058_s27 + $0x30] sm:$0xff]  ;;  %v984_v1 = vld [vmem:[%s3091_s22] sm:$0xff] }
  0x61   : > { %1049 = vperm.xlu1 %2670, %v1003_v23   ;;  %1039 = vperm.xlu0 %2669, %v1001_v26   ;;  %v985_v0 = vld [vmem:[%s3091_s22 + $0x8] sm:$0xff]  ;;  %v637_v2 = vld [vmem:[%s3058_s27 + $0x38] sm:$0xff]  ;;  %v638_v3 = vld [vmem:[%s3058_s27 + $0x40] sm:$0xff]  ;;  %s3554_s14 = scalar_lea.vmem [#allocation7], %s2592_s24 }
  0x62   : > { %v987_v4 = vld [vmem:[%s3091_s22 + $0x18] sm:$0xff]  ;;  %v986_v5 = vld [vmem:[%s3091_s22 + $0x10] sm:$0xff]  ;;  %v639_v6 = vld [vmem:[%s3058_s27 + $0x48] sm:$0xff] }
  0x63   : > { %2527 = vmatpush3.bf16.msra.mxu1 %v2492_v13  ;;  %2495 = vmatpush3.bf16.msra.mxu0 %v2492_v13  ;;  %v640_v7 = vld [vmem:[%s3058_s27 + $0x50] sm:$0xff]  ;;  %v989_v8 = vld [vmem:[%s3091_s22 + $0x28] sm:$0xff]  ;;  %v988_v9 = vld [vmem:[%s3091_s22 + $0x20] sm:$0xff] }
  0x64   : > { %2529 = vmatprep.subr.bf16.mxu1 %v2496_v22  ;;  %2497 = vmatprep.subr.bf16.mxu0 %v2496_v22  ;;  %v641_v10 = vld [vmem:[%s3058_s27 + $0x58] sm:$0xff]  ;;  %v642_v11 = vld [vmem:[%s3058_s27 + $0x60] sm:$0xff]  ;;  %v990_v13 = vld [vmem:[%s3091_s22 + $0x30] sm:$0xff] }
  0x65   : > { %1059 = vperm.xlu1 %2670, %v1005_v30   ;;  %1054 = vperm.xlu0 %2669, %v1004_v33   ;;  %v991_v12 = vld [vmem:[%s3091_s22 + $0x38] sm:$0xff]  ;;  %v643_v14 = vld [vmem:[%s3058_s27 + $0x68] sm:$0xff]  ;;  %v644_v15 = vld [vmem:[%s3058_s27 + $0x70] sm:$0xff] }
  0x66   : > { %v993_v16 = vld [vmem:[%s3091_s22 + $0x48] sm:$0xff]  ;;  %v992_v17 = vld [vmem:[%s3091_s22 + $0x40] sm:$0xff]  ;;  %v645_v18 = vld [vmem:[%s3058_s27 + $0x78] sm:$0xff] }
  0x67   : > { %2531 = vmatpush3.bf16.msra.mxu1 %v2496_v22  ;;  %2499 = vmatpush3.bf16.msra.mxu0 %v2496_v22  ;;  %v995_v19 = vld [vmem:[%s3091_s22 + $0x58] sm:$0xff]  ;;  %v994_v20 = vld [vmem:[%s3091_s22 + $0x50] sm:$0xff]  ;;  %v997_v21 = vld [vmem:[%s3091_s22 + $0x68] sm:$0xff] }
  0x68   : > { %2533 = vmatprep.subr.bf16.mxu1 %v2500_v29  ;;  %2501 = vmatprep.subr.bf16.mxu0 %v2500_v29  ;;  %v996_v22 = vld [vmem:[%s3091_s22 + $0x60] sm:$0xff]  ;;  %v999_v23 = vld [vmem:[%s3091_s22 + $0x78] sm:$0xff]  ;;  %v998_v24 = vld [vmem:[%s3091_s22 + $0x70] sm:$0xff] }
  0x69   : > { %1069 = vperm.xlu1 %2670, %v1007_v37   ;;  %1064 = vperm.xlu0 %2669, %v1006_v40   ;;  %v447_v25 = vld [vmem:[%s3124_s11] sm:$0xff]  ;;  %v448_v26 = vld [vmem:[%s3124_s11 + $0x8] sm:$0xff]  ;;  %v449_v27 = vld [vmem:[%s3124_s11 + $0x10] sm:$0xff] }
  0x6a   : > { %2344 = vmatprep.mubr.f32.mxu0 %v447_v25  ;;  %v450_v28 = vld [vmem:[%s3124_s11 + $0x18] sm:$0xff]  ;;  %v452_v30 = vld [vmem:[%s3124_s11 + $0x28] sm:$0xff]  ;;  %v453_v31 = vld [vmem:[%s3124_s11 + $0x30] sm:$0xff] }
  0x6b   : > { %2535 = vmatpush3.bf16.msra.mxu1 %v2500_v29  ;;  %2503 = vmatpush3.bf16.msra.mxu0 %v2500_v29  ;;  %v451_v29 = vld [vmem:[%s3124_s11 + $0x20] sm:$0xff]  ;;  %v454_v32 = vld [vmem:[%s3124_s11 + $0x38] sm:$0xff]  ;;  %v456_v34 = vld [vmem:[%s3124_s11 + $0x48] sm:$0xff] }
  0x6c   : > { %2537 = vmatprep.subr.bf16.mxu1 %v2504_v36  ;;  %2505 = vmatprep.subr.bf16.mxu0 %v2504_v36  ;;  %v455_v33 = vld [vmem:[%s3124_s11 + $0x40] sm:$0xff]  ;;  %v457_v35 = vld [vmem:[%s3124_s11 + $0x50] sm:$0xff]  ;;  %v460_v38 = vld [vmem:[%s3124_s11 + $0x68] sm:$0xff] }
  0x6d   : > { %1079 = vperm.xlu1 %2670, %v1009_v44   ;;  %1074 = vperm.xlu0 %2669, %v1008_v45   ;;  %v459_v37 = vld [vmem:[%s3124_s11 + $0x60] sm:$0xff]  ;;  %v461_v39 = vld [vmem:[%s3124_s11 + $0x70] sm:$0xff]  ;;  %v462_v40 = vld [vmem:[%s3124_s11 + $0x78] sm:$0xff] }
  0x6e   : > { %v807_v41 = vld [vmem:[#allocation5] sm:$0xff] }
  0x6f   : > { %2539 = vmatpush3.bf16.msra.mxu1 %v2504_v36  ;;  %2507 = vmatpush3.bf16.msra.mxu0 %v2504_v36  ;;  %v458_v36 = vld [vmem:[%s3124_s11 + $0x58] sm:$0xff]  ;;  %v815_v42 = vld [vmem:[#allocation5 + $0x40] sm:$0xff] }
  0x70   : > { %2541 = vmatprep.subr.bf16.mxu1 %v2508_v43  ;;  %2509 = vmatprep.subr.bf16.mxu0 %v2508_v43 }
  0x71   : > { %1089 = vperm.xlu1 %2670, %v1011_v48   ;;  %1084 = vperm.xlu0 %2669, %v1010_v49  }
  0x73   : > { %2543 = vmatpush3.bf16.msra.mxu1 %v2508_v43  ;;  %2511 = vmatpush3.bf16.msra.mxu0 %v2508_v43 }
  0x75   : > { %1099 = vperm.xlu1 %2670, %v1013_v54   ;;  %1094 = vperm.xlu0 %2669, %v1012_v55  }
  0x76   : > { %2401 = vmatmul.mubr.f32.vlgmr.msra.gmra.mrb[0].mxu1 %v631_v52  ;;  %2345 = vmatmul.mubr.f32.vlgmr.msra.gmra.mrb[0].mxu0 %v448_v26 }
  0x77   : > { %2403 = vmatprep.mubr.f32.mxu1 %v632_v53  ;;  %2347 = vmatprep.mubr.f32.mxu0 %v449_v27 }
  0x79   : > { %1109 = vperm.xlu1 %2670, %v1015_v60   ;;  %1104 = vperm.xlu0 %2669, %v1014_v61  }
  0x7a   : > { %2404 = vmatmul.mubr.f32.gmra.mrb[2].mxu1 %v633_v58  ;;  %2348 = vmatmul.mubr.f32.gmra.mrb[2].mxu0 %v450_v28 }
  0x7b   : > { %2406 = vmatprep.mubr.f32.mxu1 %v634_v59  ;;  %2350 = vmatprep.mubr.f32.mxu0 %v451_v29 }
  0x7d   : > { %1135 = vperm.xlu1 %2670, %v985_v0   ;;  %1130 = vperm.xlu0 %2669, %v984_v1  }
  0x7e   : > { %2407 = vmatmul.mubr.f32.gmra.mrb[4].mxu1 %v635_v62  ;;  %2351 = vmatmul.mubr.f32.gmra.mrb[4].mxu0 %v452_v30 }
  0x7f   : > { %2409 = vmatprep.mubr.f32.mxu1 %v636_v63  ;;  %2353 = vmatprep.mubr.f32.mxu0 %v453_v31  ;;  %v3177_v63 = vld [vmem:[%s4062_s5] ss:$0 sm:$0xff] }
  0x81   : > { %1145 = vperm.xlu1 %2670, %v987_v4   ;;  %1140 = vperm.xlu0 %2669, %v986_v5  }
  0x82   : > { %2410 = vmatmul.mubr.f32.gmra.mrb[6].mxu1 %v637_v2  ;;  %2354 = vmatmul.mubr.f32.gmra.mrb[6].mxu0 %v454_v32 }
  0x83   : > { %2412 = vmatprep.mubr.f32.mxu1 %v638_v3  ;;  %2356 = vmatprep.mubr.f32.mxu0 %v455_v33 }
  0x85   : > { %1155 = vperm.xlu1 %2670, %v989_v8   ;;  %1150 = vperm.xlu0 %2669, %v988_v9  }
  0x86   : > { %2413 = vmatmul.mubr.f32.gmra.mrb[8].mxu1 %v639_v6  ;;  %2357 = vmatmul.mubr.f32.gmra.mrb[8].mxu0 %v456_v34 }
  0x87   : > { %2415 = vmatprep.mubr.f32.mxu1 %v640_v7  ;;  %2359 = vmatprep.mubr.f32.mxu0 %v457_v35 }
  0x89   : > { %1165 = vperm.xlu1 %2670, %v991_v12   ;;  %1160 = vperm.xlu0 %2669, %v990_v13  }
  0x8a   : > { %2416 = vmatmul.mubr.f32.gmra.mrb[10].mxu1 %v641_v10  ;;  %2360 = vmatmul.mubr.f32.gmra.mrb[10].mxu0 %v458_v36 }
  0x8b   : > { %2418 = vmatprep.mubr.f32.mxu1 %v642_v11  ;;  %2362 = vmatprep.mubr.f32.mxu0 %v459_v37 }
  0x8d   : > { %1175 = vperm.xlu1 %2670, %v993_v16   ;;  %1170 = vperm.xlu0 %2669, %v992_v17  }
  0x8e   : > { %2419 = vmatmul.mubr.f32.gmra.mrb[12].mxu1 %v643_v14  ;;  %2363 = vmatmul.mubr.f32.gmra.mrb[12].mxu0 %v460_v38 }
  0x8f   : > { %2421 = vmatprep.mubr.f32.mxu1 %v644_v15  ;;  %2365 = vmatprep.mubr.f32.mxu0 %v461_v39 }
  0x91   : > { %1185 = vperm.xlu1 %2670, %v995_v19   ;;  %1180 = vperm.xlu0 %2669, %v994_v20  }
  0x92   : > { %2422 = vmatmul.mubr.f32.gmra.mrb[14].mxu1 %v645_v18  ;;  %2366 = vmatmul.mubr.f32.gmra.mrb[14].mxu0 %v462_v40 }
  0x93   : > { %2456 = vmatprep.mubr.f32.mxu0 %v807_v41  ;;  %2468 = vmatprep.mubr.f32.mxu1 %v815_v42 }
  0x95   : > { %1195 = vperm.xlu1 %2670, %v997_v21   ;;  %1190 = vperm.xlu0 %2669, %v996_v22  }
  0x99   : > { %1205 = vperm.xlu1 %2670, %v999_v23   ;;  %1200 = vperm.xlu0 %2669, %v998_v24  }
  0xdc   : > { %v3142_v43 = vpop.permute.xlu1 %1044  ;;  %v3144_v44 = vpop.permute.xlu0 %1034 }
  0xe0   : > { %v3146_v45 = vpop.permute.xlu1 %1049  ;;  %v3148_v46 = vpop.permute.xlu0 %1039 }
  0xe4   : > { %v3150_v47 = vpop.permute.xlu1 %1059  ;;  %v3152_v48 = vpop.permute.xlu0 %1054 }
  0xe8   : > { %v3154_v49 = vpop.permute.xlu1 %1069  ;;  %v3156_v50 = vpop.permute.xlu0 %1064 }
  0xec   : > { %v3158_v51 = vpop.permute.xlu1 %1079  ;;  %v3160_v52 = vpop.permute.xlu0 %1074 }
  0xf0   : > { %v3162_v53 = vpop.permute.xlu1 %1089  ;;  %v3164_v54 = vpop.permute.xlu0 %1084 }
  0xf4   : > { %v3166_v55 = vpop.permute.xlu1 %1099  ;;  %v3168_v56 = vpop.permute.xlu0 %1094 }
  0xf8   : > { %v3170_v57 = vpop.permute.xlu1 %1109  ;;  %v3172_v58 = vpop.permute.xlu0 %1104 }
  0xfc   : > { %v1136_v59 = vpop.permute.xlu1 %1135  ;;  %v1131_v60 = vpop.permute.xlu0 %1130 }
 0x100   : > { %v1146_v61 = vpop.permute.xlu1 %1145  ;;  %v1141_v62 = vpop.permute.xlu0 %1140 }
 0x104   : > { %v1156_v1 = vpop.permute.xlu1 %1155  ;;  %v1151_v4 = vpop.permute.xlu0 %1150 }
 0x108   : > { %v1166_v15 = vpop.permute.xlu1 %1165  ;;  %v1161_v17 = vpop.permute.xlu0 %1160 }
 0x10c   : > { %v1176_v29 = vpop.permute.xlu1 %1175  ;;  %v1171_v33 = vpop.permute.xlu0 %1170 }
 0x149   : > { %v2402_v0 = vpop.f32.mrb[0].mxu1 }
 0x14a   : > { %v718_v2 = vadd.f32 %v2402_v0, %v3177_v63  ;;  %v712_v3 = vpop.f32.mrb[1].mxu1 }
 0x14b   : > { %v713_v5 = vadd.f32 %v3177_v63, %v712_v3 }
 0x14c   : > { %v792_v6 = vmax.f32 %v718_v2, 0.0 }
 0x14d   : > { %v791_v7 = vmax.f32 %v713_v5, 0.0  ;;  %v2405_v8 = vpop.f32.mrb[2].mxu1 }
 0x14e   : > { %v3181_v9 = vmul.f32 %v1136_v59, %v792_v6  ;;  %v728_v10 = vadd.f32 %v2405_v8, %v3177_v63  ;;  %v722_v11 = vpop.f32.mrb[3].mxu1 }
 0x14f   : > { %v2544_v12 = vpack.c.bf16 %v792_v6, %v791_v7  ;;  %v3184_v13 = vmul.f32 %v1131_v60, %v791_v7  ;;  %v723_v14 = vadd.f32 %v3177_v63, %v722_v11 }
 0x150   : > { %v794_v16 = vmax.f32 %v728_v10, 0.0  ;;  %1758 = vadd.xlane.f32.xlu0 %v3181_v9 }
 0x151   : > { %v793_v18 = vmax.f32 %v723_v14, 0.0  ;;  %v2408_v19 = vpop.f32.mrb[4].mxu1  ;;  %1756 = vadd.xlane.f32.xlu1 %v3184_v13  ;;  %2545 = vmatprep.subr.bf16.mxu0 %v2544_v12 }
 0x152   : > { %v3189_v20 = vmul.f32 %v1146_v61, %v794_v16  ;;  %v738_v21 = vadd.f32 %v2408_v19, %v3177_v63  ;;  %2576 = vmatprep.subr.bf16.mxu1 %v2544_v12  ;;  %v732_v22 = vpop.f32.mrb[5].mxu1  ;;  %2547 = vmatpush3.bf16.msra.mxu0 %v2544_v12 }
 0x153   : > { %v2548_v23 = vpack.c.bf16 %v794_v16, %v793_v18  ;;  %v3192_v24 = vmul.f32 %v1141_v62, %v793_v18  ;;  %v733_v25 = vadd.f32 %v3177_v63, %v732_v22  ;;  %2584 = vmatpush3.bf16.msra.mxu1 %v2544_v12  ;;  %v1186_v62 = vpop.permute.xlu1 %1185 }
 0x154   : > { %v796_v26 = vmax.f32 %v738_v21, 0.0  ;;  %1762 = vadd.xlane.f32.xlu0 %v3189_v20 }
 0x155   : > { %v795_v27 = vmax.f32 %v733_v25, 0.0  ;;  %v2411_v28 = vpop.f32.mrb[6].mxu1  ;;  %1760 = vadd.xlane.f32.xlu1 %v3192_v24  ;;  %2549 = vmatprep.subr.bf16.mxu0 %v2548_v23 }
 0x156   : > { %v3197_v30 = vmul.f32 %v1156_v1, %v796_v26  ;;  %v748_v31 = vadd.f32 %v2411_v28, %v3177_v63  ;;  %2577 = vmatprep.subr.bf16.mxu1 %v2548_v23  ;;  %v742_v32 = vpop.f32.mrb[7].mxu1  ;;  %2551 = vmatpush3.bf16.msra.mxu0 %v2548_v23  ;;  %v1181_v1 = vpop.permute.xlu0 %1180 }
 0x157   : > { %v2552_v34 = vpack.c.bf16 %v796_v26, %v795_v27  ;;  %v3200_v35 = vmul.f32 %v1151_v4, %v795_v27  ;;  %v743_v36 = vadd.f32 %v3177_v63, %v742_v32  ;;  %2585 = vmatpush3.bf16.msra.mxu1 %v2548_v23 }
 0x158   : > { %v798_v37 = vmax.f32 %v748_v31, 0.0  ;;  %1766 = vadd.xlane.f32.xlu0 %v3197_v30 }
 0x159   : > { %v797_v38 = vmax.f32 %v743_v36, 0.0  ;;  %v2414_v39 = vpop.f32.mrb[8].mxu1  ;;  %1764 = vadd.xlane.f32.xlu1 %v3200_v35  ;;  %2553 = vmatprep.subr.bf16.mxu0 %v2552_v34 }
 0x15a   : > { %v3205_v40 = vmul.f32 %v1166_v15, %v798_v37  ;;  %v758_v41 = vadd.f32 %v2414_v39, %v3177_v63  ;;  %2578 = vmatprep.subr.bf16.mxu1 %v2552_v34  ;;  %v752_v42 = vpop.f32.mrb[9].mxu1  ;;  %2555 = vmatpush3.bf16.msra.mxu0 %v2552_v34  ;;  %v1196_v15 = vpop.permute.xlu1 %1195 }
 0x15b   : > { %v2556_v59 = vpack.c.bf16 %v798_v37, %v797_v38  ;;  %v3208_v60 = vmul.f32 %v1161_v17, %v797_v38  ;;  %v753_v61 = vadd.f32 %v3177_v63, %v752_v42  ;;  %2586 = vmatpush3.bf16.msra.mxu1 %v2552_v34  ;;  %v1191_v19 = vpop.permute.xlu0 %1190 }
 0x15c   : > { %4095 = vst [vmem:[#allocation16_spill] sm:$0xff] %v3205_v40  ;;  %v800_v0 = vmax.f32 %v758_v41, 0.0  ;;  %1770 = vadd.xlane.f32.xlu0 %v3205_v40 }
 0x15d   : > { %v799_v2 = vmax.f32 %v753_v61, 0.0  ;;  %v2417_v3 = vpop.f32.mrb[10].mxu1  ;;  %1768 = vadd.xlane.f32.xlu1 %v3208_v60  ;;  %2557 = vmatprep.subr.bf16.mxu0 %v2556_v59  ;;  %v808_v61 = vld [vmem:[#allocation5 + $0x8] sm:$0xff] }
 0x15e   : > { %v3213_v4 = vmul.f32 %v1176_v29, %v800_v0  ;;  %v768_v5 = vadd.f32 %v2417_v3, %v3177_v63  ;;  %2579 = vmatprep.subr.bf16.mxu1 %v2556_v59  ;;  %v762_v6 = vpop.f32.mrb[11].mxu1  ;;  %2559 = vmatpush3.bf16.msra.mxu0 %v2556_v59  ;;  %v1206_v36 = vpop.permute.xlu1 %1205  ;;  %v818_v3 = vld [vmem:[#allocation5 + $0x58] sm:$0xff] }
 0x15f   : > { %v2560_v7 = vpack.c.bf16 %v800_v0, %v799_v2  ;;  %v3216_v8 = vmul.f32 %v1171_v33, %v799_v2  ;;  %v763_v10 = vadd.f32 %v3177_v63, %v762_v6  ;;  %2587 = vmatpush3.bf16.msra.mxu1 %v2556_v59  ;;  %v1201_v38 = vpop.permute.xlu0 %1200  ;;  %v809_v0 = vld [vmem:[#allocation5 + $0x10] sm:$0xff]  ;;  %v810_v2 = vld [vmem:[#allocation5 + $0x18] sm:$0xff]  ;;  %v819_v6 = vld [vmem:[#allocation5 + $0x60] sm:$0xff] }
 0x160   : > { %v802_v11 = vmax.f32 %v768_v5, 0.0  ;;  %1774 = vadd.xlane.f32.xlu0 %v3213_v4  ;;  %v811_v5 = vld [vmem:[#allocation5 + $0x20] sm:$0xff] }
 0x161   : > { %v801_v12 = vmax.f32 %v763_v10, 0.0  ;;  %v2420_v14 = vpop.f32.mrb[12].mxu1  ;;  %1772 = vadd.xlane.f32.xlu1 %v3216_v8  ;;  %2561 = vmatprep.subr.bf16.mxu0 %v2560_v7  ;;  %v820_v10 = vld [vmem:[#allocation5 + $0x68] sm:$0xff] }
 0x162   : > { %v3221_v16 = vmul.f32 %v1186_v62, %v802_v11  ;;  %v778_v17 = vadd.f32 %v2420_v14, %v3177_v63  ;;  %2580 = vmatprep.subr.bf16.mxu1 %v2560_v7  ;;  %v772_v18 = vpop.f32.mrb[13].mxu1  ;;  %2563 = vmatpush3.bf16.msra.mxu0 %v2560_v7  ;;  %v816_v62 = vld [vmem:[#allocation5 + $0x48] sm:$0xff]  ;;  %v814_v14 = vld [vmem:[#allocation5 + $0x38] sm:$0xff] }
 0x163   : > { %v2564_v21 = vpack.c.bf16 %v802_v11, %v801_v12  ;;  %v3224_v22 = vmul.f32 %v1181_v1, %v801_v12  ;;  %v773_v23 = vadd.f32 %v3177_v63, %v772_v18  ;;  %2588 = vmatpush3.bf16.msra.mxu1 %v2560_v7  ;;  %v817_v1 = vld [vmem:[#allocation5 + $0x50] sm:$0xff]  ;;  %v812_v7 = vld [vmem:[#allocation5 + $0x28] sm:$0xff] }
 0x164   : > { %v804_v25 = vmax.f32 %v778_v17, 0.0  ;;  %1778 = vadd.xlane.f32.xlu0 %v3221_v16  ;;  %v813_v11 = vld [vmem:[#allocation5 + $0x30] sm:$0xff]  ;;  %v3243_v17 = vpop.f32.mrb[0].mxu0 }
 0x165   : > { %v803_v26 = vmax.f32 %v773_v23, 0.0  ;;  %v2423_v27 = vpop.f32.mrb[14].mxu1  ;;  %1776 = vadd.xlane.f32.xlu1 %v3224_v22  ;;  %2565 = vmatprep.subr.bf16.mxu0 %v2564_v21  ;;  %v821_v12 = vld [vmem:[#allocation5 + $0x70] sm:$0xff]  ;;  %v3245_v18 = vpop.f32.mrb[1].mxu0 }
 0x166   : > { %v3229_v28 = vmul.f32 %v1196_v15, %v804_v25  ;;  %v788_v29 = vadd.f32 %v2423_v27, %v3177_v63  ;;  %2581 = vmatprep.subr.bf16.mxu1 %v2564_v21  ;;  %v782_v31 = vpop.f32.mrb[15].mxu1  ;;  %2567 = vmatpush3.bf16.msra.mxu0 %v2564_v21  ;;  %v822_v15 = vld [vmem:[#allocation5 + $0x78] sm:$0xff] }
 0x167   : > { %v2568_v32 = vpack.c.bf16 %v804_v25, %v803_v26  ;;  %v3232_v33 = vmul.f32 %v1191_v19, %v803_v26  ;;  %v783_v34 = vadd.f32 %v3177_v63, %v782_v31  ;;  %2589 = vmatpush3.bf16.msra.mxu1 %v2564_v21  ;;  %v3247_v19 = vpop.f32.mrb[2].mxu0 }
 0x168   : > { %v806_v37 = vmax.f32 %v788_v29, 0.0  ;;  %1782 = vadd.xlane.f32.xlu0 %v3229_v28  ;;  %v3249_v21 = vpop.f32.mrb[3].mxu0 }
 0x169   : > { %v805_v39 = vmax.f32 %v783_v34, 0.0  ;;  %1780 = vadd.xlane.f32.xlu1 %v3232_v33  ;;  %2569 = vmatprep.subr.bf16.mxu0 %v2568_v32  ;;  %v3251_v23 = vpop.f32.mrb[4].mxu0 }
 0x16a   : > { %v3237_v41 = vmul.f32 %v1206_v36, %v806_v37  ;;  %2582 = vmatprep.subr.bf16.mxu1 %v2568_v32  ;;  %2571 = vmatpush3.bf16.msra.mxu0 %v2568_v32  ;;  %v3253_v25 = vpop.f32.mrb[5].mxu0 }
 0x16b   : > { %v2572_v42 = vpack.c.bf16 %v806_v37, %v805_v39  ;;  %v3239_v59 = vmul.f32 %v1201_v38, %v805_v39  ;;  %2590 = vmatpush3.bf16.msra.mxu1 %v2568_v32  ;;  %v3255_v26 = vpop.f32.mrb[6].mxu0 }
 0x16c   : > { %4096 = vst [vmem:[#allocation17_spill] sm:$0xff] %v3237_v41  ;;  %1786 = vadd.xlane.f32.xlu0 %v3237_v41  ;;  %v3257_v27 = vpop.f32.mrb[7].mxu0 }
 0x16d   : > { %1784 = vadd.xlane.f32.xlu1 %v3239_v59  ;;  %2573 = vmatprep.subr.bf16.mxu0 %v2572_v42  ;;  %v2358_v29 = vpop.f32.mrb[8].mxu0 }
 0x16e   : > { %2583 = vmatprep.subr.bf16.mxu1 %v2572_v42  ;;  %2575 = vmatpush3.bf16.msra.mxu0 %v2572_v42  ;;  %v575_v31 = vpop.f32.mrb[9].mxu0 }
 0x16f   : > { %2591 = vmatpush3.bf16.msra.mxu1 %v2572_v42  ;;  %v3259_v32 = vpop.f32.mrb[10].mxu0  ;;  %v1258_v42 = vlaneseq }
 0x170   : > { %v3261_v34 = vpop.f32.mrb[11].mxu0 }
 0x171   : > { %2457 = vmatmul.mubr.f32.vlgmr.msra.gmra.mrb[16].mxu0 %v808_v61  ;;  %v3263_v36 = vpop.f32.mrb[12].mxu0 }
 0x172   : > { %2469 = vmatmul.mubr.f32.vlgmr.msra.gmra.mrb[16].mxu1 %v816_v62  ;;  %2459 = vmatprep.mubr.f32.mxu0 %v809_v0  ;;  %v3265_v37 = vpop.f32.mrb[13].mxu0  ;;  %v3271_v62 = vand.u32 127, %v1258_v42 }
 0x173   : > { %2471 = vmatprep.mubr.f32.mxu1 %v817_v1  ;;  %v3267_v38 = vpop.f32.mrb[14].mxu0 }
 0x174   : > { %v3269_v39 = vpop.f32.mrb[15].mxu0  ;;  %vm1260_vm0 = vcmp.lt.s32.totalorder %v3271_v62, 32 }
 0x175   : > { %2460 = vmatmul.mubr.f32.gmra.mrb[18].mxu0 %v810_v2 }
 0x176   : > { %2472 = vmatmul.mubr.f32.gmra.mrb[18].mxu1 %v818_v3  ;;  %2462 = vmatprep.mubr.f32.mxu0 %v811_v5 }
 0x177   : > { %2474 = vmatprep.mubr.f32.mxu1 %v819_v6 }
 0x179   : > { %2463 = vmatmul.mubr.f32.gmra.mrb[20].mxu0 %v812_v7 }
 0x17a   : > { %2475 = vmatmul.mubr.f32.gmra.mrb[20].mxu1 %v820_v10  ;;  %2465 = vmatprep.mubr.f32.mxu0 %v813_v11 }
 0x17b   : > { %2477 = vmatprep.mubr.f32.mxu1 %v821_v12 }
 0x17d   : > { %2466 = vmatmul.mubr.f32.gmra.mrb[22].mxu0 %v814_v14 }
 0x17e   : > { %2478 = vmatmul.mubr.f32.gmra.mrb[22].mxu1 %v822_v15 }
 0x1dd   : > { %v1759_v61 = vpop.xlane.xlu0 %1758 }
 0x1de   : > { %v1789_v0 = vmul.f32 0.03125, %v1759_v61  ;;  %v1757_v1 = vpop.xlane.xlu1 %1756 }
 0x1df   : > { %v1788_v2 = vmul.f32 0.03125, %v1757_v1 }
 0x1e0   : > { %v3274_v3 = vsub.f32 %v3181_v9, %v1789_v0 }
 0x1e1   : > { %v3277_v5 = vsub.f32 %v3184_v13, %v1788_v2  ;;  %v1763_v6 = vpop.xlane.xlu0 %1762 }
 0x1e2   : > { %v1791_v7 = vmul.f32 0.03125, %v1763_v6  ;;  %v1761_v10 = vpop.xlane.xlu1 %1760  ;;  %v1821_v11 = vmul.f32 %v3274_v3, %v3274_v3 }
 0x1e3   : > { %4097 = vst [vmem:[#allocation18_spill] sm:$0xff] %v3277_v5  ;;  %v1790_v12 = vmul.f32 0.03125, %v1761_v10  ;;  %v1820_v14 = vmul.f32 %v3277_v5, %v3277_v5 }
 0x1e4   : > { %v3285_v15 = vsub.f32 %v3189_v20, %v1791_v7  ;;  %v1837_v42 = vsel %vm1260_vm0, %v1821_v11, 0.0 }
 0x1e5   : > { %v3290_v61 = vsub.f32 %v3192_v24, %v1790_v12  ;;  %v1767_v0 = vpop.xlane.xlu0 %1766  ;;  %1854 = vadd.xlane.f32.xlu0 %v1837_v42  ;;  %v1836_v1 = vsel %vm1260_vm0, %v1820_v14, 0.0 }
 0x1e6   : > { %4098 = vst [vmem:[#allocation19_spill] sm:$0xff] %v3285_v15  ;;  %v1793_v2 = vmul.f32 0.03125, %v1767_v0  ;;  %1852 = vadd.xlane.f32.xlu1 %v1836_v1  ;;  %v1765_v6 = vpop.xlane.xlu1 %1764  ;;  %v1823_v10 = vmul.f32 %v3285_v15, %v3285_v15 }
 0x1e7   : > { %4099 = vst [vmem:[#allocation20_spill] sm:$0xff] %v3290_v61  ;;  %v1792_v41 = vmul.f32 0.03125, %v1765_v6  ;;  %v1822_v7 = vmul.f32 %v3290_v61, %v3290_v61 }
 0x1e8   : > { %v3299_v11 = vsub.f32 %v3197_v30, %v1793_v2  ;;  %v1839_v12 = vsel %vm1260_vm0, %v1823_v10, 0.0 }
 0x1e9   : > { %v3304_v42 = vsub.f32 %v3200_v35, %v1792_v41  ;;  %v1771_v14 = vpop.xlane.xlu0 %1770  ;;  %1858 = vadd.xlane.f32.xlu0 %v1839_v12  ;;  %v1838_v0 = vsel %vm1260_vm0, %v1822_v7, 0.0 }
 0x1ea   : > { %4100 = vst [vmem:[#allocation21_spill] sm:$0xff] %v3299_v11  ;;  %v1795_v1 = vmul.f32 0.03125, %v1771_v14  ;;  %1856 = vadd.xlane.f32.xlu1 %v1838_v0  ;;  %v1769_v6 = vpop.xlane.xlu1 %1768  ;;  %v1825_v61 = vmul.f32 %v3299_v11, %v3299_v11 }
 0x1eb   : > { %4101 = vst [vmem:[#allocation22_spill] sm:$0xff] %v3304_v42  ;;  %v1794_v2 = vmul.f32 0.03125, %v1769_v6  ;;  %v1824_v15 = vmul.f32 %v3304_v42, %v3304_v42  ;;  %v541_v6 = vadd.f32 %v3243_v17, %v3177_v63 }
 0x1ec   : > { %v3313_v10 = vsub.f32 %v3205_v40, %v1795_v1  ;;  %v1841_v41 = vsel %vm1260_vm0, %v1825_v61, 0.0 }
 0x1ed   : > { %v3318_v12 = vsub.f32 %v3208_v60, %v1794_v2  ;;  %1862 = vadd.xlane.f32.xlu0 %v1841_v41  ;;  %v1840_v7 = vsel %vm1260_vm0, %v1824_v15, 0.0  ;;  %v536_v15 = vadd.f32 %v3177_v63, %v3245_v18  ;;  %v581_v2 = vadd.f32 %v2358_v29, %v3177_v63 }
 0x1ee   : > { %4102 = vst [vmem:[#allocation23_spill] sm:$0xff] %v3313_v10  ;;  %1860 = vadd.xlane.f32.xlu1 %v1840_v7  ;;  %v1827_v14 = vmul.f32 %v3313_v10, %v3313_v10  ;;  %v576_v41 = vadd.f32 %v3177_v63, %v575_v31  ;;  %v615_v7 = vmax.f32 %v541_v6, 0.0  ;;  %v586_v18 = vadd.f32 %v3177_v63, %v3261_v34 }
 0x1ef   : > { %4103 = vst [vmem:[#allocation24_spill] sm:$0xff] %v3318_v12  ;;  %v1826_v0 = vmul.f32 %v3318_v12, %v3318_v12  ;;  %v591_v12 = vadd.f32 %v3259_v32, %v3177_v63  ;;  %v561_v6 = vadd.f32 %v3251_v23, %v3177_v63  ;;  %v601_v34 = vadd.f32 %v3263_v36, %v3177_v63 }
 0x1f0   : > { %v1843_v1 = vsel %vm1260_vm0, %v1827_v14, 0.0  ;;  %v551_v14 = vadd.f32 %v3247_v19, %v3177_v63  ;;  %v622_v10 = vmax.f32 %v576_v41, 0.0  ;;  %v556_v41 = vadd.f32 %v3177_v63, %v3253_v25 }
 0x1f1   : > { %1866 = vadd.xlane.f32.xlu0 %v1843_v1  ;;  %v1842_v61 = vsel %vm1260_vm0, %v1826_v0, 0.0  ;;  %v546_v1 = vadd.f32 %v3177_v63, %v3249_v21  ;;  %v614_v0 = vmax.f32 %v536_v15, 0.0  ;;  %v625_v5 = vmax.f32 %v591_v12, 0.0 }
 0x1f2   : > { %1864 = vadd.xlane.f32.xlu1 %v1842_v61  ;;  %v623_v61 = vmax.f32 %v581_v2, 0.0  ;;  %v617_v21 = vmax.f32 %v551_v14, 0.0  ;;  %v596_v14 = vadd.f32 %v3177_v63, %v3265_v37 }
 0x1f3   : > { %v616_v15 = vmax.f32 %v546_v1, 0.0 }
 0x244   : > { %v2458_v17 = vpop.f32.mrb[16].mxu0 }
 0x245   : > { %v1017_v29 = vmul.f32 %v2458_v17, %v615_v7  ;;  %v2470_v42 = vpop.f32.mrb[16].mxu1  ;;  %v889_v31 = vpop.f32.mrb[17].mxu0  ;;  %v618_v17 = vmax.f32 %v556_v41, 0.0 }
 0x246   : > { %v1025_v19 = vmul.f32 %v2470_v42, %v623_v61  ;;  %v1016_v11 = vmul.f32 %v889_v31, %v614_v0  ;;  %v929_v40 = vpop.f32.mrb[17].mxu1  ;;  %v624_v42 = vmax.f32 %v586_v18, 0.0  ;;  %v566_v18 = vadd.f32 %v3177_v63, %v3257_v27 }
 0x247   : > { %v3348_v2 = vmul.f32 %v3148_v46, %v1017_v29  ;;  %v1024_v32 = vmul.f32 %v929_v40, %v622_v10  ;;  %v619_v40 = vmax.f32 %v561_v6, 0.0  ;;  %v627_v29 = vmax.f32 %v601_v34, 0.0 }
 0x248   : > { %v3355_v7 = vmul.f32 %v3158_v51, %v1025_v19  ;;  %v2461_v23 = vpop.f32.mrb[18].mxu0  ;;  %v571_v51 = vadd.f32 %v3255_v26, %v3177_v63  ;;  %v3364_v36 = vmul.f32 %v3144_v44, %v1016_v11  ;;  %v626_v6 = vmax.f32 %v596_v14, 0.0 }
 0x249   : > { %v1019_v1 = vmul.f32 %v2461_v23, %v617_v21  ;;  %v2473_v0 = vpop.f32.mrb[18].mxu1  ;;  %1263 = vadd.xlane.f32.xlu1 %v3348_v2  ;;  %v899_v46 = vpop.f32.mrb[19].mxu0  ;;  %v3367_v61 = vmul.f32 %v3160_v52, %v1024_v32  ;;  %v606_v26 = vadd.f32 %v3177_v63, %v3269_v39  ;;  %v620_v34 = vmax.f32 %v566_v18, 0.0 }
 0x24a   : > { %v1027_v10 = vmul.f32 %v2473_v0, %v625_v5  ;;  %v939_v25 = vpop.f32.mrb[19].mxu1  ;;  %1279 = vadd.xlane.f32.xlu0 %v3355_v7  ;;  %v1018_v12 = vmul.f32 %v899_v46, %v616_v15  ;;  %v611_v5 = vadd.f32 %v3267_v38, %v3177_v63  ;;  %v621_v27 = vmax.f32 %v571_v51, 0.0 }
 0x24b   : > { %v1026_v37 = vmul.f32 %v939_v25, %v624_v42  ;;  %v1224_v41 = vsub.f32 0.0, %v3364_v36  ;;  %v3382_v63 = vmul.f32 %v3146_v45, %v1019_v1  ;;  %v628_v42 = vmax.f32 %v606_v26, 0.0 }
 0x24c   : > { %v2464_v31 = vpop.f32.mrb[20].mxu0  ;;  %v629_v23 = vmax.f32 %v611_v5, 0.0  ;;  %v1232_v45 = vsub.f32 0.0, %v3367_v61  ;;  %v3393_v1 = vmul.f32 %v3162_v53, %v1027_v10  ;;  %v3408_v53 = vmul.f32 %v3142_v43, %v1018_v12  ;;  %v3413_v5 = vpop.xlane.xlu0 %1774 }
 0x24d   : > { %v1021_v19 = vmul.f32 %v2464_v31, %v619_v40  ;;  %v2476_v44 = vpop.f32.mrb[20].mxu1  ;;  %v909_v11 = vpop.f32.mrb[21].mxu0  ;;  %1277 = vadd.xlane.f32.xlu1 %v3367_v61  ;;  %v3378_v32 = vmul.f32 %v3164_v54, %v1026_v37  ;;  %v3389_v37 = vsub.f32 %v1224_v41, %v3184_v13  ;;  %v1233_v13 = vsub.f32 0.0, %v3355_v7 }
 0x24e   : > { %v1029_v52 = vmul.f32 %v2476_v44, %v627_v29  ;;  %v1020_v21 = vmul.f32 %v909_v11, %v618_v17  ;;  %v949_v15 = vpop.f32.mrb[21].mxu1  ;;  %1261 = vadd.xlane.f32.xlu0 %v3364_v36  ;;  %v1225_v17 = vsub.f32 0.0, %v3348_v2  ;;  %v3399_v18 = vsub.f32 %v1232_v45, %v3216_v8 }
 0x24f   : > { %v1028_v38 = vmul.f32 %v949_v15, %v626_v6  ;;  %v3416_v31 = vsub.f32 %v1233_v13, %v3213_v4  ;;  %v1773_v6 = vpop.xlane.xlu1 %1772  ;;  %v1226_v26 = vsub.f32 0.0, %v3408_v53  ;;  %v1234_v44 = vsub.f32 0.0, %v3378_v32 }
 0x250   : > { %v2467_v39 = vpop.f32.mrb[22].mxu0  ;;  %v3402_v29 = vsub.f32 %v1225_v17, %v3181_v9  ;;  %v3411_v10 = vmul.f32 %v3152_v48, %v1020_v21  ;;  %v3425_v43 = vpop.xlane.xlu0 %1778  ;;  %v3433_v11 = vmul.f32 %v3150_v47, %v1021_v19  ;;  %v3443_v15 = vmul.f32 %v3166_v55, %v1029_v52 }
 0x251   : > { %v1023_v14 = vmul.f32 %v2467_v39, %v621_v27  ;;  %v2479_v0 = vpop.f32.mrb[22].mxu1  ;;  %v919_v46 = vpop.f32.mrb[23].mxu0  ;;  %1281 = vadd.xlane.f32.xlu1 %v3378_v32  ;;  %v3421_v9 = vmul.f32 %v3168_v56, %v1028_v38  ;;  %v3429_v12 = vsub.f32 %v1226_v26, %v3192_v24  ;;  %v3438_v56 = vsub.f32 %v1234_v44, %v3224_v22 }
 0x252   : > { %v3385_v40 = vmul.f32 %v2479_v0, %v629_v23  ;;  %v1022_v25 = vmul.f32 %v919_v46, %v620_v34  ;;  %v959_v54 = vpop.f32.mrb[23].mxu1  ;;  %1267 = vadd.xlane.f32.xlu0 %v3382_v63  ;;  %v1227_v24 = vsub.f32 0.0, %v3382_v63  ;;  %v1235_v38 = vsub.f32 0.0, %v3393_v1 }
 0x253   : > { %v1030_v51 = vmul.f32 %v959_v54, %v628_v42  ;;  %v1777_v48 = vpop.xlane.xlu1 %1776  ;;  %v1228_v34 = vsub.f32 0.0, %v3411_v10  ;;  %v1236_v0 = vsub.f32 0.0, %v3421_v9  ;;  %v1796_v54 = vmul.f32 0.03125, %v1773_v6 }
 0x254   : > { %v3440_v21 = vpop.xlane.xlu0 %1782  ;;  %v3449_v47 = vmul.f32 %v3156_v50, %v1022_v25  ;;  %v3452_v19 = vsub.f32 %v1227_v24, %v3189_v20  ;;  %v3466_v50 = vsub.f32 %v1235_v38, %v3221_v16  ;;  %v1229_v6 = vsub.f32 0.0, %v3433_v11 }
 0x255   : > { %1515 = vadd.xlane.f32.xlu1 %v3389_v37  ;;  %v3462_v52 = vmul.f32 %v3172_v58, %v1030_v51  ;;  %v3471_v42 = vsub.f32 %v1228_v34, %v3200_v35  ;;  %v3475_v58 = vmul.f32 %v3154_v49, %v1023_v14  ;;  %v3480_v35 = vsub.f32 %v1236_v0, %v3232_v33 }
 0x256   : > { %1283 = vadd.xlane.f32.xlu0 %v3393_v1  ;;  %v1230_v26 = vsub.f32 0.0, %v3449_v47  ;;  %v3485_v49 = vmul.f32 %v3170_v57, %v3385_v40  ;;  %v3490_v24 = vsub.f32 %v3216_v8, %v1796_v54  ;;  %v1798_v38 = vmul.f32 0.03125, %v1777_v48 }
 0x257   : > { %v1781_v27 = vpop.xlane.xlu1 %1780  ;;  %v1238_v40 = vsub.f32 0.0, %v3462_v52  ;;  %v1237_v8 = vsub.f32 0.0, %v3443_v15 }
 0x258   : > { %v3456_v41 = vpop.xlane.xlu0 %1786  ;;  %v3494_v57 = vsub.f32 %v1230_v26, %v3208_v60 }
 0x259   : > { %1531 = vadd.xlane.f32.xlu1 %v3399_v18 }
 0x25a   : > { %1517 = vadd.xlane.f32.xlu0 %v3402_v29 }
 0x25b   : > { %v3459_v55 = vpop.xlane.xlu1 %1784 }
 0x25d   : > { %1269 = vadd.xlane.f32.xlu1 %v3411_v10 }
 0x25e   : > { %1533 = vadd.xlane.f32.xlu0 %v3416_v31 }
 0x261   : > { %1285 = vadd.xlane.f32.xlu1 %v3421_v9 }
 0x262   : > { %1265 = vadd.xlane.f32.xlu0 %v3408_v53 }
 0x265   : > { %1519 = vadd.xlane.f32.xlu1 %v3429_v12 }
 0x266   : > { %1271 = vadd.xlane.f32.xlu0 %v3433_v11 }
 0x269   : > { %1535 = vadd.xlane.f32.xlu1 %v3438_v56 }
 0x26a   : > { %1287 = vadd.xlane.f32.xlu0 %v3443_v15 }
 0x26d   : > { %1273 = vadd.xlane.f32.xlu1 %v3449_v47 }
 0x26e   : > { %1521 = vadd.xlane.f32.xlu0 %v3452_v19 }
 0x271   : > { %1289 = vadd.xlane.f32.xlu1 %v3462_v52 }
 0x272   : > { %1537 = vadd.xlane.f32.xlu0 %v3466_v50  ;;  %v1855_v20 = vpop.xlane.xlu0 %1854 }
 0x273   : > { %v1885_v23 = vmul.f32 0.03125, %v1855_v20  ;;  %v1853_v39 = vpop.xlane.xlu1 %1852 }
 0x274   : > { %v1884_v46 = vmul.f32 0.03125, %v1853_v39 }
 0x275   : > { %v1901_v25 = vadd.f32 1e-05, %v1885_v23  ;;  %1523 = vadd.xlane.f32.xlu1 %v3471_v42 }
 0x276   : > { %v1900_v51 = vadd.f32 1e-05, %v1884_v46  ;;  %1275 = vadd.xlane.f32.xlu0 %v3475_v58  ;;  %v1859_v45 = vpop.xlane.xlu0 %1858  ;;  %v3498_v46 = vsub.f32 %v1229_v6, %v3197_v30 }
 0x277   : > { %2671 = vrsqrt.f32 %v1901_v25  ;;  %v1887_v17 = vmul.f32 0.03125, %v1859_v45  ;;  %v1857_v13 = vpop.xlane.xlu1 %1856  ;;  %v3503_v25 = vsub.f32 %v3224_v22, %v1798_v38  ;;  %v1800_v45 = vmul.f32 0.03125, %v1781_v27  ;;  %v3521_v27 = vld [vmem:[%s4064_s7] ss:$0 sm:$0xff] }
 0x278   : > { %2673 = vrsqrt.f32 %v1900_v51  ;;  %v1886_v14 = vmul.f32 0.03125, %v1857_v13  ;;  %v1828_v51 = vmul.f32 %v3490_v24, %v3490_v24  ;;  %v3509_v13 = vsub.f32 %v1238_v40, %v3239_v59  ;;  %v3534_v40 = vld [vmem:[%s4065_s8] ss:$0 sm:$0xff] }
 0x279   : > { %v1903_v44 = vadd.f32 1e-05, %v1887_v17  ;;  %1539 = vadd.xlane.f32.xlu1 %v3480_v35  ;;  %v3512_v22 = vsub.f32 %v1237_v8, %v3229_v28 }
 0x27a   : > { %v1902_v34 = vadd.f32 1e-05, %v1886_v14  ;;  %1291 = vadd.xlane.f32.xlu0 %v3485_v49  ;;  %v1863_v20 = vpop.xlane.xlu0 %1862  ;;  %v1231_v14 = vsub.f32 0.0, %v3475_v58 }
 0x27b   : > { %2675 = vrsqrt.f32 %v1903_v44  ;;  %v1889_v23 = vmul.f32 0.03125, %v1863_v20  ;;  %v1861_v39 = vpop.xlane.xlu1 %1860  ;;  %v1797_v44 = vmul.f32 0.03125, %v3413_v5  ;;  %v3529_v5 = vsub.f32 %v3232_v33, %v1800_v45 }
 0x27c   : > { %2677 = vrsqrt.f32 %v1902_v34  ;;  %v1888_v0 = vmul.f32 0.03125, %v1861_v39  ;;  %v1844_v39 = vsel %vm1260_vm0, %v1828_v51, 0.0  ;;  %v1239_v33 = vsub.f32 0.0, %v3485_v49 }
 0x27d   : > { %v1905_v48 = vadd.f32 1e-05, %v1889_v23  ;;  %1527 = vadd.xlane.f32.xlu1 %v3494_v57  ;;  %v3545_v45 = vsub.f32 %v3213_v4, %v1797_v44 }
 0x27e   : > { %v1904_v54 = vadd.f32 1e-05, %v1888_v0  ;;  %1525 = vadd.xlane.f32.xlu0 %v3498_v46  ;;  %v1867_v60 = vpop.xlane.xlu0 %1866  ;;  %v4104_v0 = vld [vmem:[#allocation18_spill] sm:$0xff] }
 0x27f   : > { %2679 = vrsqrt.f32 %v1905_v48  ;;  %v1891_v30 = vmul.f32 0.03125, %v1867_v60  ;;  %v1865_v17 = vpop.xlane.xlu1 %1864 }
 0x280   : > { %2681 = vrsqrt.f32 %v1904_v54  ;;  %v1890_v26 = vmul.f32 0.03125, %v1865_v17  ;;  %v4105_v54 = vld [vmem:[#allocation16_spill] sm:$0xff] }
 0x281   : > { %v2672_v6 = vpop.eup %2671  ;;  %v1907_v38 = vadd.f32 1e-05, %v1891_v30  ;;  %1543 = vadd.xlane.f32.xlu1 %v3509_v13  ;;  %v3541_v60 = vsub.f32 %v1231_v14, %v4105_v54  ;;  %v1799_v30 = vmul.f32 0.03125, %v3425_v43  ;;  %v4108_v43 = vld [vmem:[#allocation17_spill] sm:$0xff]  ;;  %v1801_v54 = vmul.f32 0.03125, %v3440_v21 }
 0x282   : > { %v2674_v34 = vpop.eup %2673  ;;  %v1933_v20 = vmul.f32 %v2672_v6, %v3274_v3  ;;  %v1906_v23 = vadd.f32 1e-05, %v1890_v26  ;;  %1541 = vadd.xlane.f32.xlu0 %v3512_v22  ;;  %v1830_v3 = vmul.f32 %v3503_v25, %v3503_v25  ;;  %v3559_v44 = vsub.f32 %v1239_v33, %v4108_v43 }
 0x283   : > { %v1932_v8 = vmul.f32 %v2674_v34, %v4104_v0  ;;  %2683 = vrsqrt.f32 %v1907_v38  ;;  %v4106_v38 = vld [vmem:[#allocation19_spill] sm:$0xff]  ;;  %v1832_v0 = vmul.f32 %v3529_v5, %v3529_v5  ;;  %v1829_v33 = vmul.f32 %v3545_v45, %v3545_v45 }
 0x284   : > { %v1949_v48 = vmul.f32 %v3521_v27, %v1933_v20  ;;  %2685 = vrsqrt.f32 %v1906_v23  ;;  %v4107_v20 = vld [vmem:[#allocation20_spill] sm:$0xff] }
 0x285   : > { %v2676_v51 = vpop.eup %2675  ;;  %v1948_v17 = vmul.f32 %v3521_v27, %v1932_v8  ;;  %1868 = vadd.xlane.f32.xlu1 %v1844_v39  ;;  %v1846_v39 = vsel %vm1260_vm0, %v1830_v3, 0.0 }
 0x286   : > { %v2678_v26 = vpop.eup %2677  ;;  %v1965_v6 = vadd.f32 %v3534_v40, %v1949_v48  ;;  %v1935_v34 = vmul.f32 %v2676_v51, %v4106_v38  ;;  %1529 = vadd.xlane.f32.xlu0 %v3541_v60  ;;  %v3566_v48 = vsub.f32 %v3221_v16, %v1799_v30  ;;  %v4110_v30 = vld [vmem:[#allocation22_spill] sm:$0xff] }
 0x287   : > { %v1964_v14 = vadd.f32 %v3534_v40, %v1948_v17  ;;  %v1934_v23 = vmul.f32 %v2678_v26, %v4107_v20  ;;  %v4109_v26 = vld [vmem:[#allocation21_spill] sm:$0xff]  ;;  %v3583_v20 = vsub.f32 %v3229_v28, %v1801_v54  ;;  %v4112_v54 = vld [vmem:[#allocation24_spill] sm:$0xff] }
 0x288   : > { %2196 = vst [vmem:[%s3554_s14 + $0x108] sm:$0xff] %v1965_v6  ;;  %v1951_v4 = vmul.f32 %v3521_v27, %v1935_v34  ;;  %v1848_v34 = vsel %vm1260_vm0, %v1832_v0, 0.0 }
 0x289   : > { %v2680_v8 = vpop.eup %2679  ;;  %2195 = vst [vmem:[%s3554_s14 + $0x100] sm:$0xff] %v1964_v14  ;;  %v1950_v51 = vmul.f32 %v3521_v27, %v1934_v23  ;;  %1872 = vadd.xlane.f32.xlu1 %v1846_v39  ;;  %v1831_v39 = vmul.f32 %v3566_v48, %v3566_v48 }
 0x28a   : > { %v2682_v17 = vpop.eup %2681  ;;  %v1967_v3 = vadd.f32 %v3534_v40, %v1951_v4  ;;  %v1937_v6 = vmul.f32 %v2680_v8, %v4109_v26  ;;  %1545 = vadd.xlane.f32.xlu0 %v3559_v44  ;;  %v1845_v4 = vsel %vm1260_vm0, %v1829_v33, 0.0 }
 0x28b   : > { %v1966_v16 = vadd.f32 %v3534_v40, %v1950_v51  ;;  %v1936_v38 = vmul.f32 %v2682_v17, %v4110_v30  ;;  %v4111_v51 = vld [vmem:[#allocation23_spill] sm:$0xff] }
 0x28c   : > { %2198 = vst [vmem:[%s3554_s14 + $0x118] sm:$0xff] %v1967_v3  ;;  %v1953_v21 = vmul.f32 %v3521_v27, %v1937_v6  ;;  %v1847_v6 = vsel %vm1260_vm0, %v1831_v39, 0.0 }
 0x28d   : > { %v2684_v14 = vpop.eup %2683  ;;  %2197 = vst [vmem:[%s3554_s14 + $0x110] sm:$0xff] %v1966_v16  ;;  %v1952_v23 = vmul.f32 %v3521_v27, %v1936_v38  ;;  %1876 = vadd.xlane.f32.xlu1 %v1848_v34  ;;  %v1833_v16 = vmul.f32 %v3583_v20, %v3583_v20 }
 0x28e   : > { %v2686_v8 = vpop.eup %2685  ;;  %v1969_v0 = vadd.f32 %v3534_v40, %v1953_v21  ;;  %v1939_v17 = vmul.f32 %v2684_v14, %v4111_v51  ;;  %1870 = vadd.xlane.f32.xlu0 %v1845_v4 }
 0x28f   : > { %v1968_v28 = vadd.f32 %v3534_v40, %v1952_v23  ;;  %v1938_v3 = vmul.f32 %v2686_v8, %v4112_v54  ;;  %v1849_v21 = vsel %vm1260_vm0, %v1833_v16, 0.0 }
 0x290   : > { %2200 = vst [vmem:[%s3554_s14 + $0x128] sm:$0xff] %v1969_v0  ;;  %v1955_v26 = vmul.f32 %v3521_v27, %v1939_v17 }
 0x291   : > { %2199 = vst [vmem:[%s3554_s14 + $0x120] sm:$0xff] %v1968_v28  ;;  %v1954_v33 = vmul.f32 %v3521_v27, %v1938_v3 }
 0x292   : > { %v1971_v30 = vadd.f32 %v3534_v40, %v1955_v26  ;;  %1874 = vadd.xlane.f32.xlu0 %v1847_v6 }
 0x293   : > { %v1970_v38 = vadd.f32 %v3534_v40, %v1954_v33 }
 0x294   : > { %2202 = vst [vmem:[%s3554_s14 + $0x138] sm:$0xff] %v1971_v30 }
 0x295   : > { %2201 = vst [vmem:[%s3554_s14 + $0x130] sm:$0xff] %v1970_v38 }
 0x296   : > { %1878 = vadd.xlane.f32.xlu0 %v1849_v21 }
 0x2d6   : > { %v1264_v34 = vpop.xlane.xlu1 %1263 }
 0x2d7   : > { %v1280_v14 = vpop.xlane.xlu0 %1279  ;;  %v1294_v23 = vmul.f32 0.03125, %v1264_v34 }
 0x2d8   : > { %v1302_v4 = vmul.f32 0.03125, %v1280_v14 }
 0x2d9   : > { %v3610_v39 = vsub.f32 %v3348_v2, %v1294_v23 }
 0x2da   : > { %v3613_v8 = vsub.f32 %v3355_v7, %v1302_v4  ;;  %v1278_v0 = vpop.xlane.xlu1 %1277 }
 0x2db   : > { %v1301_v51 = vmul.f32 0.03125, %v1278_v0  ;;  %v1262_v17 = vpop.xlane.xlu0 %1261  ;;  %v1326_v28 = vmul.f32 %v3610_v39, %v3610_v39 }
 0x2dc   : > { %v1293_v54 = vmul.f32 0.03125, %v1262_v17  ;;  %v1334_v26 = vmul.f32 %v3613_v8, %v3613_v8 }
 0x2dd   : > { %v1344_v3 = vsel %vm1260_vm0, %v1326_v28, 0.0  ;;  %v3622_v33 = vsub.f32 %v3367_v61, %v1301_v51 }
 0x2de   : > { %v3625_v2 = vsub.f32 %v3364_v36, %v1293_v54  ;;  %v1282_v7 = vpop.xlane.xlu1 %1281  ;;  %1361 = vadd.xlane.f32.xlu0 %v1344_v3  ;;  %v1352_v38 = vsel %vm1260_vm0, %v1334_v26, 0.0 }
 0x2df   : > { %v1268_v6 = vpop.xlane.xlu0 %1267  ;;  %v1333_v36 = vmul.f32 %v3622_v33, %v3622_v33 }
 0x2e0   : > { %v1296_v16 = vmul.f32 0.03125, %v1268_v6  ;;  %v1325_v30 = vmul.f32 %v3625_v2, %v3625_v2 }
 0x2e1   : > { %v1351_v51 = vsel %vm1260_vm0, %v1333_v36, 0.0 }
 0x2e2   : > { %v3632_v21 = vsub.f32 %v3382_v63, %v1296_v16  ;;  %1377 = vadd.xlane.f32.xlu0 %v1352_v38  ;;  %v1343_v61 = vsel %vm1260_vm0, %v1325_v30, 0.0  ;;  %v1516_v34 = vpop.xlane.xlu1 %1515 }
 0x2e3   : > { %v1284_v14 = vpop.xlane.xlu0 %1283  ;;  %1359 = vadd.xlane.f32.xlu1 %v1343_v61  ;;  %v1303_v61 = vmul.f32 0.03125, %v1282_v7 }
 0x2e4   : > { %v1304_v23 = vmul.f32 0.03125, %v1284_v14  ;;  %v1328_v4 = vmul.f32 %v3632_v21, %v3632_v21 }
 0x2e6   : > { %v3641_v0 = vsub.f32 %v3393_v1, %v1304_v23  ;;  %v1346_v63 = vsel %vm1260_vm0, %v1328_v4, 0.0  ;;  %v1532_v17 = vpop.xlane.xlu1 %1531 }
 0x2e7   : > { %1365 = vadd.xlane.f32.xlu0 %v1346_v63  ;;  %v1518_v28 = vpop.xlane.xlu0 %1517  ;;  %1375 = vadd.xlane.f32.xlu1 %v1351_v51  ;;  %v1547_v51 = vmul.f32 0.03125, %v1516_v34  ;;  %v1555_v34 = vmul.f32 0.03125, %v1532_v17 }
 0x2e8   : > { %v1548_v54 = vmul.f32 0.03125, %v1518_v28  ;;  %v1336_v3 = vmul.f32 %v3641_v0, %v3641_v0  ;;  %v3664_v28 = vsub.f32 %v3378_v32, %v1303_v61 }
 0x2ea   : > { %v3650_v26 = vsub.f32 %v3402_v29, %v1548_v54  ;;  %v1354_v1 = vsel %vm1260_vm0, %v1336_v3, 0.0  ;;  %v1270_v6 = vpop.xlane.xlu1 %1269  ;;  %v1335_v61 = vmul.f32 %v3664_v28, %v3664_v28 }
 0x2eb   : > { %1381 = vadd.xlane.f32.xlu0 %v1354_v1  ;;  %v1534_v16 = vpop.xlane.xlu0 %1533 }
 0x2ec   : > { %v1556_v30 = vmul.f32 0.03125, %v1534_v16  ;;  %v1580_v38 = vmul.f32 %v3650_v26, %v3650_v26 }
 0x2ee   : > { %v3657_v36 = vsub.f32 %v3416_v31, %v1556_v30  ;;  %v1596_v14 = vsel %vm1260_vm0, %v1580_v38, 0.0  ;;  %v1286_v23 = vpop.xlane.xlu1 %1285  ;;  %v3674_v30 = vsub.f32 %v3389_v37, %v1547_v51 }
 0x2ef   : > { %1613 = vadd.xlane.f32.xlu0 %v1596_v14  ;;  %v1266_v29 = vpop.xlane.xlu0 %1265 }
 0x2f0   : > { %v1295_v4 = vmul.f32 0.03125, %v1266_v29  ;;  %v1588_v63 = vmul.f32 %v3657_v36, %v3657_v36  ;;  %v1579_v37 = vmul.f32 %v3674_v30, %v3674_v30 }
 0x2f2   : > { %v3667_v54 = vsub.f32 %v3408_v53, %v1295_v4  ;;  %v1604_v31 = vsel %vm1260_vm0, %v1588_v63, 0.0  ;;  %v1520_v7 = vpop.xlane.xlu1 %1519  ;;  %v1297_v63 = vmul.f32 0.03125, %v1270_v6 }
 0x2f3   : > { %1629 = vadd.xlane.f32.xlu0 %v1604_v31  ;;  %v1272_v3 = vpop.xlane.xlu0 %1271  ;;  %v1353_v31 = vsel %vm1260_vm0, %v1335_v61, 0.0 }
 0x2f4   : > { %v1298_v1 = vmul.f32 0.03125, %v1272_v3  ;;  %v1327_v16 = vmul.f32 %v3667_v54, %v3667_v54 }
 0x2f6   : > { %v3677_v32 = vsub.f32 %v3433_v11, %v1298_v1  ;;  %v1345_v53 = vsel %vm1260_vm0, %v1327_v16, 0.0  ;;  %v1536_v38 = vpop.xlane.xlu1 %1535  ;;  %v3688_v11 = vsub.f32 %v3399_v18, %v1555_v34  ;;  %v3700_v18 = vsub.f32 %v3411_v10, %v1297_v63 }
 0x2f7   : > { %v1288_v14 = vpop.xlane.xlu0 %1287  ;;  %1363 = vadd.xlane.f32.xlu1 %v1345_v53  ;;  %v1305_v34 = vmul.f32 0.03125, %v1286_v23  ;;  %v1549_v63 = vmul.f32 0.03125, %v1520_v7 }
 0x2f8   : > { %v1306_v29 = vmul.f32 0.03125, %v1288_v14  ;;  %v1330_v4 = vmul.f32 %v3677_v32, %v3677_v32  ;;  %v1329_v23 = vmul.f32 %v3700_v18, %v3700_v18 }
 0x2fa   : > { %v3691_v17 = vsub.f32 %v3443_v15, %v1306_v29  ;;  %v1348_v51 = vsel %vm1260_vm0, %v1330_v4, 0.0  ;;  %v1274_v3 = vpop.xlane.xlu1 %1273  ;;  %v1595_v15 = vsel %vm1260_vm0, %v1579_v37, 0.0  ;;  %v1587_v29 = vmul.f32 %v3688_v11, %v3688_v11 }
 0x2fb   : > { %1369 = vadd.xlane.f32.xlu0 %v1348_v51  ;;  %v1522_v1 = vpop.xlane.xlu0 %1521  ;;  %1379 = vadd.xlane.f32.xlu1 %v1353_v31 }
 0x2fc   : > { %v1550_v6 = vmul.f32 0.03125, %v1522_v1  ;;  %v1338_v16 = vmul.f32 %v3691_v17, %v3691_v17  ;;  %v1603_v1 = vsel %vm1260_vm0, %v1587_v29, 0.0 }
 0x2fe   : > { %v3705_v53 = vsub.f32 %v3452_v19, %v1550_v6  ;;  %v1356_v61 = vsel %vm1260_vm0, %v1338_v16, 0.0  ;;  %v1290_v14 = vpop.xlane.xlu1 %1289  ;;  %v3716_v19 = vsub.f32 %v3421_v9, %v1305_v34  ;;  %v3728_v9 = vsub.f32 %v3429_v12, %v1549_v63 }
 0x2ff   : > { %1385 = vadd.xlane.f32.xlu0 %v1356_v61  ;;  %v1538_v4 = vpop.xlane.xlu0 %1537  ;;  %1611 = vadd.xlane.f32.xlu1 %v1595_v15  ;;  %v1557_v34 = vmul.f32 0.03125, %v1536_v38  ;;  %v1299_v63 = vmul.f32 0.03125, %v1274_v3 }
 0x300   : > { %v1558_v51 = vmul.f32 0.03125, %v1538_v4  ;;  %v1582_v10 = vmul.f32 %v3705_v53, %v3705_v53  ;;  %v1581_v38 = vmul.f32 %v3728_v9, %v3728_v9 }
 0x302   : > { %v3719_v37 = vsub.f32 %v3466_v50, %v1558_v51  ;;  %v1598_v31 = vsel %vm1260_vm0, %v1582_v10, 0.0  ;;  %v1524_v6 = vpop.xlane.xlu1 %1523  ;;  %v1347_v50 = vsel %vm1260_vm0, %v1329_v23, 0.0  ;;  %v1337_v51 = vmul.f32 %v3716_v19, %v3716_v19 }
 0x303   : > { %1617 = vadd.xlane.f32.xlu0 %v1598_v31  ;;  %v1276_v16 = vpop.xlane.xlu0 %1275  ;;  %1627 = vadd.xlane.f32.xlu1 %v1603_v1 }
 0x304   : > { %v1300_v7 = vmul.f32 0.03125, %v1276_v16  ;;  %v1590_v15 = vmul.f32 %v3719_v37, %v3719_v37  ;;  %v1355_v16 = vsel %vm1260_vm0, %v1337_v51, 0.0 }
 0x306   : > { %v3733_v61 = vsub.f32 %v3475_v58, %v1300_v7  ;;  %v1606_v29 = vsel %vm1260_vm0, %v1590_v15, 0.0  ;;  %v1540_v4 = vpop.xlane.xlu1 %1539  ;;  %v3744_v58 = vsub.f32 %v3438_v56, %v1557_v34  ;;  %v3756_v56 = vsub.f32 %v3449_v47, %v1299_v63 }
 0x307   : > { %1633 = vadd.xlane.f32.xlu0 %v1606_v29  ;;  %v1292_v10 = vpop.xlane.xlu0 %1291  ;;  %1367 = vadd.xlane.f32.xlu1 %v1347_v50  ;;  %v1307_v34 = vmul.f32 0.03125, %v1290_v14  ;;  %v1551_v63 = vmul.f32 0.03125, %v1524_v6 }
 0x308   : > { %v1308_v31 = vmul.f32 0.03125, %v1292_v10  ;;  %v1332_v12 = vmul.f32 %v3733_v61, %v3733_v61  ;;  %v1331_v14 = vmul.f32 %v3756_v56, %v3756_v56 }
 0x30a   : > { %v3747_v23 = vsub.f32 %v3485_v49, %v1308_v31  ;;  %v1350_v1 = vsel %vm1260_vm0, %v1332_v12, 0.0  ;;  %v1528_v7 = vpop.xlane.xlu1 %1527  ;;  %v1597_v49 = vsel %vm1260_vm0, %v1581_v38, 0.0  ;;  %v1589_v31 = vmul.f32 %v3744_v58, %v3744_v58 }
 0x30b   : > { %1373 = vadd.xlane.f32.xlu0 %v1350_v1  ;;  %v1526_v15 = vpop.xlane.xlu0 %1525  ;;  %1383 = vadd.xlane.f32.xlu1 %v1355_v16 }
 0x30c   : > { %v1552_v3 = vmul.f32 0.03125, %v1526_v15  ;;  %v1340_v50 = vmul.f32 %v3747_v23, %v3747_v23  ;;  %v1605_v15 = vsel %vm1260_vm0, %v1589_v31, 0.0 }
 0x30e   : > { %v3761_v29 = vsub.f32 %v3498_v46, %v1552_v3  ;;  %v1358_v51 = vsel %vm1260_vm0, %v1340_v50, 0.0  ;;  %v1544_v10 = vpop.xlane.xlu1 %1543  ;;  %v3772_v46 = vsub.f32 %v3462_v52, %v1307_v34  ;;  %v1803_v52 = vmul.f32 0.03125, %v3456_v41 }
 0x30f   : > { %1389 = vadd.xlane.f32.xlu0 %v1358_v51  ;;  %v1542_v12 = vpop.xlane.xlu0 %1541  ;;  %1615 = vadd.xlane.f32.xlu1 %v1597_v49 }
 0x310   : > { %v1560_v1 = vmul.f32 0.03125, %v1542_v12  ;;  %v1584_v47 = vmul.f32 %v3761_v29, %v3761_v29  ;;  %v1349_v12 = vsel %vm1260_vm0, %v1331_v14, 0.0 }
 0x312   : > { %v3775_v38 = vsub.f32 %v3512_v22, %v1560_v1  ;;  %v1600_v16 = vsel %vm1260_vm0, %v1584_v47, 0.0  ;;  %v1869_v3 = vpop.xlane.xlu1 %1868  ;;  %v3785_v22 = vsub.f32 %v3471_v42, %v1551_v63  ;;  %v1559_v1 = vmul.f32 0.03125, %v1540_v4 }
 0x313   : > { %1621 = vadd.xlane.f32.xlu0 %v1600_v16  ;;  %v1530_v50 = vpop.xlane.xlu0 %1529  ;;  %1631 = vadd.xlane.f32.xlu1 %v1605_v15  ;;  %v1892_v6 = vmul.f32 0.03125, %v1869_v3  ;;  %v1339_v15 = vmul.f32 %v3772_v46, %v3772_v46  ;;  %v3799_v4 = vsub.f32 %v4108_v43, %v1803_v52 }
 0x314   : > { %v1554_v49 = vmul.f32 0.03125, %v1530_v50  ;;  %v1592_v51 = vmul.f32 %v3775_v38, %v3775_v38  ;;  %v1583_v50 = vmul.f32 %v3785_v22, %v3785_v22 }
 0x315   : > { %v1908_v34 = vadd.f32 1e-05, %v1892_v6  ;;  %v3804_v6 = vsub.f32 %v3480_v35, %v1559_v1 }
 0x316   : > { %v3790_v31 = vsub.f32 %v3541_v60, %v1554_v49  ;;  %v1608_v47 = vsel %vm1260_vm0, %v1592_v51, 0.0  ;;  %v1873_v16 = vpop.xlane.xlu1 %1872  ;;  %v1553_v60 = vmul.f32 0.03125, %v1528_v7 }
 0x317   : > { %2687 = vrsqrt.f32 %v1908_v34  ;;  %1637 = vadd.xlane.f32.xlu0 %v1608_v47  ;;  %v1546_v41 = vpop.xlane.xlu0 %1545  ;;  %1371 = vadd.xlane.f32.xlu1 %v1349_v12  ;;  %v1894_v42 = vmul.f32 0.03125, %v1873_v16  ;;  %v1357_v34 = vsel %vm1260_vm0, %v1339_v15, 0.0  ;;  %v1599_v47 = vsel %vm1260_vm0, %v1583_v50, 0.0 }
 0x318   : > { %v1562_v63 = vmul.f32 0.03125, %v1546_v41  ;;  %v1586_v14 = vmul.f32 %v3790_v31, %v3790_v31  ;;  %v3816_v1 = vsub.f32 %v3494_v57, %v1553_v60  ;;  %v1835_v16 = vmul.f32 %v3799_v4, %v3799_v4 }
 0x319   : > { %v1910_v3 = vadd.f32 1e-05, %v1894_v42  ;;  %v1561_v15 = vmul.f32 0.03125, %v1544_v10 }
 0x31a   : > { %v3807_v49 = vsub.f32 %v3559_v44, %v1562_v63  ;;  %v1602_v51 = vsel %vm1260_vm0, %v1586_v14, 0.0  ;;  %v1877_v12 = vpop.xlane.xlu1 %1876  ;;  %v1591_v63 = vmul.f32 %v3804_v6, %v3804_v6  ;;  %v1851_v50 = vsel %vm1260_vm0, %v1835_v16, 0.0 }
 0x31b   : > { %2689 = vrsqrt.f32 %v1910_v3  ;;  %1625 = vadd.xlane.f32.xlu0 %v1602_v51  ;;  %v1871_v43 = vpop.xlane.xlu0 %1870  ;;  %1387 = vadd.xlane.f32.xlu1 %v1357_v34  ;;  %v1896_v7 = vmul.f32 0.03125, %v1877_v12  ;;  %v1802_v3 = vmul.f32 0.03125, %v3459_v55  ;;  %v1585_v10 = vmul.f32 %v3816_v1, %v3816_v1 }
 0x31c   : > { %v1893_v52 = vmul.f32 0.03125, %v1871_v43  ;;  %v1594_v35 = vmul.f32 %v3807_v49, %v3807_v49  ;;  %v3832_v51 = vsub.f32 %v3509_v13, %v1561_v15  ;;  %v1607_v43 = vsel %vm1260_vm0, %v1591_v63, 0.0 }
 0x31d   : > { %v1912_v44 = vadd.f32 1e-05, %v1896_v7  ;;  %v1601_v13 = vsel %vm1260_vm0, %v1585_v10, 0.0 }
 0x31e   : > { %v1909_v41 = vadd.f32 1e-05, %v1893_v52  ;;  %v1610_v42 = vsel %vm1260_vm0, %v1594_v35, 0.0  ;;  %v1593_v15 = vmul.f32 %v3832_v51, %v3832_v51 }
 0x31f   : > { %2691 = vrsqrt.f32 %v1912_v44  ;;  %1641 = vadd.xlane.f32.xlu0 %v1610_v42  ;;  %v1875_v14 = vpop.xlane.xlu0 %1874  ;;  %1619 = vadd.xlane.f32.xlu1 %v1599_v47  ;;  %v3839_v44 = vsub.f32 %v3239_v59, %v1802_v3 }
 0x320   : > { %2693 = vrsqrt.f32 %v1909_v41  ;;  %v1895_v57 = vmul.f32 0.03125, %v1875_v14 }
 0x321   : > { %v2688_v60 = vpop.eup %2687 }
 0x322   : > { %v1940_v34 = vmul.f32 %v2688_v60, %v3490_v24  ;;  %v1911_v12 = vadd.f32 1e-05, %v1895_v57  ;;  %v1834_v57 = vmul.f32 %v3839_v44, %v3839_v44 }
 0x323   : > { %1882 = vadd.xlane.f32.xlu0 %v1851_v50  ;;  %v1879_v7 = vpop.xlane.xlu0 %1878  ;;  %1635 = vadd.xlane.f32.xlu1 %v1607_v43 }
 0x324   : > { %v1956_v55 = vmul.f32 %v3521_v27, %v1940_v34  ;;  %2695 = vrsqrt.f32 %v1911_v12  ;;  %v1897_v52 = vmul.f32 0.03125, %v1879_v7 }
 0x325   : > { %v2690_v35 = vpop.eup %2689 }
 0x326   : > { %v1972_v24 = vadd.f32 %v3534_v40, %v1956_v55  ;;  %v1942_v47 = vmul.f32 %v2690_v35, %v3503_v25  ;;  %v1913_v16 = vadd.f32 1e-05, %v1897_v52  ;;  %v1609_v25 = vsel %vm1260_vm0, %v1593_v15, 0.0 }
 0x327   : > { %1623 = vadd.xlane.f32.xlu1 %v1601_v13 }
 0x328   : > { %2203 = vst [vmem:[%s3554_s14 + $0x140] sm:$0xff] %v1972_v24  ;;  %v1958_v41 = vmul.f32 %v3521_v27, %v1942_v47  ;;  %2697 = vrsqrt.f32 %v1913_v16 }
 0x329   : > { %v2692_v42 = vpop.eup %2691 }
 0x32a   : > { %v2694_v59 = vpop.eup %2693  ;;  %v1974_v63 = vadd.f32 %v3534_v40, %v1958_v41  ;;  %v1944_v14 = vmul.f32 %v2692_v42, %v3529_v5  ;;  %v1850_v5 = vsel %vm1260_vm0, %v1834_v57, 0.0 }
 0x32b   : > { %v1941_v60 = vmul.f32 %v2694_v59, %v3545_v45  ;;  %1639 = vadd.xlane.f32.xlu1 %v1609_v25 }
 0x32c   : > { %2205 = vst [vmem:[%s3554_s14 + $0x150] sm:$0xff] %v1974_v63  ;;  %v1960_v3 = vmul.f32 %v3521_v27, %v1944_v14 }
 0x32d   : > { %v1957_v50 = vmul.f32 %v3521_v27, %v1941_v60 }
 0x32e   : > { %v2696_v10 = vpop.eup %2695  ;;  %v1976_v34 = vadd.f32 %v3534_v40, %v1960_v3 }
 0x32f   : > { %v1973_v12 = vadd.f32 %v3534_v40, %v1957_v50  ;;  %v1943_v43 = vmul.f32 %v2696_v10, %v3566_v48  ;;  %1880 = vadd.xlane.f32.xlu1 %v1850_v5 }
 0x330   : > { %2207 = vst [vmem:[%s3554_s14 + $0x160] sm:$0xff] %v1976_v34 }
 0x331   : > { %2204 = vst [vmem:[%s3554_s14 + $0x148] sm:$0xff] %v1973_v12  ;;  %v1959_v45 = vmul.f32 %v3521_v27, %v1943_v43 }
 0x332   : > { %v2698_v7 = vpop.eup %2697 }
 0x333   : > { %v1975_v55 = vadd.f32 %v3534_v40, %v1959_v45  ;;  %v1945_v52 = vmul.f32 %v2698_v7, %v3583_v20 }
 0x335   : > { %2206 = vst [vmem:[%s3554_s14 + $0x158] sm:$0xff] %v1975_v55  ;;  %v1961_v35 = vmul.f32 %v3521_v27, %v1945_v52 }
 0x337   : > { %v1977_v62 = vadd.f32 %v3534_v40, %v1961_v35 }
 0x339   : > { %2208 = vst [vmem:[%s3554_s14 + $0x168] sm:$0xff] %v1977_v62 }
 0x36b   : > { %v1362_v13 = vpop.xlane.xlu0 %1361 }
 0x36c   : > { %v1392_v24 = vmul.f32 0.03125, %v1362_v13 }
 0x36e   : > { %v1408_v47 = vadd.f32 1e-05, %v1392_v24 }
 0x36f   : > { %v1378_v48 = vpop.xlane.xlu0 %1377 }
 0x370   : > { %2699 = vrsqrt.f32 %v1408_v47  ;;  %v1400_v16 = vmul.f32 0.03125, %v1378_v48  ;;  %v1360_v15 = vpop.xlane.xlu1 %1359 }
 0x371   : > { %v1391_v41 = vmul.f32 0.03125, %v1360_v15 }
 0x372   : > { %v1416_v42 = vadd.f32 1e-05, %v1400_v16 }
 0x373   : > { %v1407_v59 = vadd.f32 1e-05, %v1391_v41 }
 0x374   : > { %2701 = vrsqrt.f32 %v1416_v42  ;;  %v1366_v63 = vpop.xlane.xlu0 %1365  ;;  %v1376_v14 = vpop.xlane.xlu1 %1375 }
 0x375   : > { %2703 = vrsqrt.f32 %v1407_v59  ;;  %v1394_v20 = vmul.f32 0.03125, %v1366_v63  ;;  %v1399_v25 = vmul.f32 0.03125, %v1376_v14 }
 0x377   : > { %v1410_v57 = vadd.f32 1e-05, %v1394_v20  ;;  %v1415_v60 = vadd.f32 1e-05, %v1399_v25 }
 0x378   : > { %v1382_v3 = vpop.xlane.xlu0 %1381 }
 0x379   : > { %2705 = vrsqrt.f32 %v1410_v57  ;;  %v1402_v50 = vmul.f32 0.03125, %v1382_v3 }
 0x37a   : > { %v2700_v10 = vpop.eup %2699  ;;  %2707 = vrsqrt.f32 %v1415_v60 }
 0x37b   : > { %v1440_v34 = vmul.f32 %v2700_v10, %v3610_v39  ;;  %v1418_v5 = vadd.f32 1e-05, %v1402_v50 }
 0x37c   : > { %v1614_v12 = vpop.xlane.xlu0 %1613 }
 0x37d   : > { %v1462_v43 = vmul.f32 %v3521_v27, %v1440_v34  ;;  %2709 = vrsqrt.f32 %v1418_v5  ;;  %v1644_v45 = vmul.f32 0.03125, %v1614_v12 }
 0x37e   : > { %v2702_v7 = vpop.eup %2701 }
 0x37f   : > { %v2704_v55 = vpop.eup %2703  ;;  %v1484_v52 = vadd.f32 %v3534_v40, %v1462_v43  ;;  %v1448_v35 = vmul.f32 %v2702_v7, %v3613_v8  ;;  %v1660_v62 = vadd.f32 1e-05, %v1644_v45 }
 0x380   : > { %v1439_v13 = vmul.f32 %v2704_v55, %v3625_v2  ;;  %v1630_v24 = vpop.xlane.xlu0 %1629 }
 0x381   : > { %1500 = vst [vmem:[%s3554_s14 + $0x8] sm:$0xff] %v1484_v52  ;;  %v1470_v39 = vmul.f32 %v3521_v27, %v1448_v35  ;;  %2711 = vrsqrt.f32 %v1660_v62  ;;  %v1652_v47 = vmul.f32 0.03125, %v1630_v24 }
 0x382   : > { %v1461_v48 = vmul.f32 %v3521_v27, %v1439_v13 }
 0x383   : > { %v2706_v16 = vpop.eup %2705  ;;  %v1492_v15 = vadd.f32 %v3534_v40, %v1470_v39  ;;  %v1668_v41 = vadd.f32 1e-05, %v1652_v47 }
 0x384   : > { %v2708_v42 = vpop.eup %2707  ;;  %v1483_v8 = vadd.f32 %v3534_v40, %v1461_v48  ;;  %v1442_v59 = vmul.f32 %v2706_v16, %v3632_v21  ;;  %v1364_v63 = vpop.xlane.xlu1 %1363 }
 0x385   : > { %1508 = vst [vmem:[%s3554_s14 + $0x48] sm:$0xff] %v1492_v15  ;;  %v1447_v2 = vmul.f32 %v2708_v42, %v3622_v33  ;;  %2713 = vrsqrt.f32 %v1668_v41  ;;  %v1393_v14 = vmul.f32 0.03125, %v1364_v63 }
 0x386   : > { %1499 = vst [vmem:[%s3554_s14] sm:$0xff] %v1483_v8  ;;  %v1464_v20 = vmul.f32 %v3521_v27, %v1442_v59 }
 0x387   : > { %v2710_v25 = vpop.eup %2709  ;;  %v1469_v57 = vmul.f32 %v3521_v27, %v1447_v2  ;;  %v1409_v60 = vadd.f32 1e-05, %v1393_v14 }
 0x388   : > { %v1486_v3 = vadd.f32 %v3534_v40, %v1464_v20  ;;  %v1450_v50 = vmul.f32 %v2710_v25, %v3641_v0  ;;  %v1370_v21 = vpop.xlane.xlu0 %1369  ;;  %v1380_v10 = vpop.xlane.xlu1 %1379 }
 0x389   : > { %v1491_v34 = vadd.f32 %v3534_v40, %v1469_v57  ;;  %2715 = vrsqrt.f32 %v1409_v60  ;;  %v1396_v33 = vmul.f32 0.03125, %v1370_v21  ;;  %v1401_v5 = vmul.f32 0.03125, %v1380_v10 }
 0x38a   : > { %1502 = vst [vmem:[%s3554_s14 + $0x18] sm:$0xff] %v1486_v3  ;;  %v1472_v12 = vmul.f32 %v3521_v27, %v1450_v50 }
 0x38b   : > { %v2712_v43 = vpop.eup %2711  ;;  %1507 = vst [vmem:[%s3554_s14 + $0x40] sm:$0xff] %v1491_v34  ;;  %v1412_v45 = vadd.f32 1e-05, %v1396_v33  ;;  %v1417_v7 = vadd.f32 1e-05, %v1401_v5 }
 0x38c   : > { %v1494_v55 = vadd.f32 %v3534_v40, %v1472_v12  ;;  %v1692_v52 = vmul.f32 %v2712_v43, %v3650_v26  ;;  %v1386_v0 = vpop.xlane.xlu0 %1385  ;;  %v1612_v35 = vpop.xlane.xlu1 %1611 }
 0x38d   : > { %2717 = vrsqrt.f32 %v1412_v45  ;;  %v1404_v62 = vmul.f32 0.03125, %v1386_v0  ;;  %v1643_v13 = vmul.f32 0.03125, %v1612_v35 }
 0x38e   : > { %1510 = vst [vmem:[%s3554_s14 + $0x58] sm:$0xff] %v1494_v55  ;;  %v1708_v24 = vmul.f32 %v3521_v27, %v1692_v52  ;;  %2719 = vrsqrt.f32 %v1417_v7 }
 0x38f   : > { %v2714_v39 = vpop.eup %2713  ;;  %v1420_v47 = vadd.f32 1e-05, %v1404_v62  ;;  %v1659_v48 = vadd.f32 1e-05, %v1643_v13 }
 0x390   : > { %v1724_v16 = vadd.f32 %v3534_v40, %v1708_v24  ;;  %v1700_v15 = vmul.f32 %v2714_v39, %v3657_v36  ;;  %v1618_v41 = vpop.xlane.xlu0 %1617  ;;  %v1628_v42 = vpop.xlane.xlu1 %1627 }
 0x391   : > { %2721 = vrsqrt.f32 %v1420_v47  ;;  %v1646_v26 = vmul.f32 0.03125, %v1618_v41  ;;  %v1651_v8 = vmul.f32 0.03125, %v1628_v42 }
 0x392   : > { %2180 = vst [vmem:[%s3554_s14 + $0x88] sm:$0xff] %v1724_v16  ;;  %v1716_v59 = vmul.f32 %v3521_v27, %v1700_v15  ;;  %2723 = vrsqrt.f32 %v1659_v48 }
 0x393   : > { %v2716_v63 = vpop.eup %2715  ;;  %v1662_v2 = vadd.f32 1e-05, %v1646_v26  ;;  %v1667_v14 = vadd.f32 1e-05, %v1651_v8 }
 0x394   : > { %v1732_v20 = vadd.f32 %v3534_v40, %v1716_v59  ;;  %v1441_v25 = vmul.f32 %v2716_v63, %v3667_v54  ;;  %v1634_v57 = vpop.xlane.xlu0 %1633  ;;  %v1368_v60 = vpop.xlane.xlu1 %1367 }
 0x395   : > { %2725 = vrsqrt.f32 %v1662_v2  ;;  %v1654_v36 = vmul.f32 0.03125, %v1634_v57  ;;  %v1395_v3 = vmul.f32 0.03125, %v1368_v60 }
 0x396   : > { %2188 = vst [vmem:[%s3554_s14 + $0xc8] sm:$0xff] %v1732_v20  ;;  %v1463_v50 = vmul.f32 %v3521_v27, %v1441_v25  ;;  %2727 = vrsqrt.f32 %v1667_v14 }
 0x397   : > { %v2718_v21 = vpop.eup %2717  ;;  %v1670_v10 = vadd.f32 1e-05, %v1654_v36  ;;  %v1411_v34 = vadd.f32 1e-05, %v1395_v3 }
 0x398   : > { %v2720_v33 = vpop.eup %2719  ;;  %v1485_v5 = vadd.f32 %v3534_v40, %v1463_v50  ;;  %v1444_v12 = vmul.f32 %v2718_v21, %v3677_v32  ;;  %v1374_v43 = vpop.xlane.xlu0 %1373 }
 0x399   : > { %v1384_v54 = vpop.xlane.xlu1 %1383  ;;  %v1449_v45 = vmul.f32 %v2720_v33, %v3664_v28  ;;  %2729 = vrsqrt.f32 %v1670_v10  ;;  %v1398_v7 = vmul.f32 0.03125, %v1374_v43 }
 0x39a   : > { %v1403_v55 = vmul.f32 0.03125, %v1384_v54  ;;  %1501 = vst [vmem:[%s3554_s14 + $0x10] sm:$0xff] %v1485_v5  ;;  %v1466_v52 = vmul.f32 %v3521_v27, %v1444_v12  ;;  %2731 = vrsqrt.f32 %v1411_v34 }
 0x39b   : > { %v2722_v0 = vpop.eup %2721  ;;  %v1471_v35 = vmul.f32 %v3521_v27, %v1449_v45  ;;  %v1414_v62 = vadd.f32 1e-05, %v1398_v7 }
 0x39c   : > { %v1419_v13 = vadd.f32 1e-05, %v1403_v55  ;;  %v2724_v24 = vpop.eup %2723  ;;  %v1488_v32 = vadd.f32 %v3534_v40, %v1466_v52  ;;  %v1452_v39 = vmul.f32 %v2722_v0, %v3691_v17  ;;  %v1390_v28 = vpop.xlane.xlu0 %1389 }
 0x39d   : > { %v1616_v47 = vpop.xlane.xlu1 %1615  ;;  %v1493_v48 = vadd.f32 %v3534_v40, %v1471_v35  ;;  %v1691_v16 = vmul.f32 %v2724_v24, %v3674_v30  ;;  %2733 = vrsqrt.f32 %v1414_v62  ;;  %v1406_v15 = vmul.f32 0.03125, %v1390_v28 }
 0x39e   : > { %1504 = vst [vmem:[%s3554_s14 + $0x28] sm:$0xff] %v1488_v32  ;;  %v1474_v41 = vmul.f32 %v3521_v27, %v1452_v39  ;;  %2735 = vrsqrt.f32 %v1419_v13  ;;  %v1645_v42 = vmul.f32 0.03125, %v1616_v47 }
 0x39f   : > { %v2726_v26 = vpop.eup %2725  ;;  %1509 = vst [vmem:[%s3554_s14 + $0x50] sm:$0xff] %v1493_v48  ;;  %v1707_v8 = vmul.f32 %v3521_v27, %v1691_v16  ;;  %v1422_v59 = vadd.f32 1e-05, %v1406_v15 }
 0x3a0   : > { %v2728_v17 = vpop.eup %2727  ;;  %v1496_v63 = vadd.f32 %v3534_v40, %v1474_v41  ;;  %v1694_v2 = vmul.f32 %v2726_v26, %v3705_v53  ;;  %v1661_v30 = vadd.f32 1e-05, %v1645_v42  ;;  %v1622_v14 = vpop.xlane.xlu0 %1621 }
 0x3a1   : > { %v1632_v20 = vpop.xlane.xlu1 %1631  ;;  %v1723_v25 = vadd.f32 %v3534_v40, %v1707_v8  ;;  %v1699_v57 = vmul.f32 %v2728_v17, %v3688_v11  ;;  %2737 = vrsqrt.f32 %v1422_v59  ;;  %v1648_v60 = vmul.f32 0.03125, %v1622_v14 }
 0x3a2   : > { %1512 = vst [vmem:[%s3554_s14 + $0x68] sm:$0xff] %v1496_v63  ;;  %v1710_v36 = vmul.f32 %v3521_v27, %v1694_v2  ;;  %2739 = vrsqrt.f32 %v1661_v30  ;;  %v1653_v3 = vmul.f32 0.03125, %v1632_v20 }
 0x3a3   : > { %v2730_v50 = vpop.eup %2729  ;;  %2179 = vst [vmem:[%s3554_s14 + $0x80] sm:$0xff] %v1723_v25  ;;  %v1715_v21 = vmul.f32 %v3521_v27, %v1699_v57  ;;  %v1664_v53 = vadd.f32 1e-05, %v1648_v60 }
 0x3a4   : > { %v2732_v10 = vpop.eup %2731  ;;  %v1726_v34 = vadd.f32 %v3534_v40, %v1710_v36  ;;  %v1702_v33 = vmul.f32 %v2730_v50, %v3719_v37  ;;  %v1669_v11 = vadd.f32 1e-05, %v1653_v3  ;;  %v1638_v5 = vpop.xlane.xlu0 %1637 }
 0x3a5   : > { %v1372_v12 = vpop.xlane.xlu1 %1371  ;;  %v1731_v43 = vadd.f32 %v3534_v40, %v1715_v21  ;;  %v1443_v54 = vmul.f32 %v2732_v10, %v3700_v18  ;;  %2741 = vrsqrt.f32 %v1664_v53  ;;  %v1656_v45 = vmul.f32 0.03125, %v1638_v5 }
 0x3a6   : > { %2182 = vst [vmem:[%s3554_s14 + $0x98] sm:$0xff] %v1726_v34  ;;  %v1718_v7 = vmul.f32 %v3521_v27, %v1702_v33  ;;  %2743 = vrsqrt.f32 %v1669_v11  ;;  %v1397_v55 = vmul.f32 0.03125, %v1372_v12 }
 0x3a7   : > { %v2734_v52 = vpop.eup %2733  ;;  %2187 = vst [vmem:[%s3554_s14 + $0xc0] sm:$0xff] %v1731_v43  ;;  %v1465_v0 = vmul.f32 %v3521_v27, %v1443_v54  ;;  %v1672_v37 = vadd.f32 1e-05, %v1656_v45  ;;  %v3945_v27 = vld [vmem:[%s4064_s7] ss:$0 sm:$0xff] }
 0x3a8   : > { %v2736_v35 = vpop.eup %2735  ;;  %v1734_v62 = vadd.f32 %v3534_v40, %v1718_v7  ;;  %v1446_v13 = vmul.f32 %v2734_v52, %v3733_v61  ;;  %v1413_v18 = vadd.f32 1e-05, %v1397_v55  ;;  %v1626_v24 = vpop.xlane.xlu0 %1625 }
 0x3a9   : > { %v1388_v32 = vpop.xlane.xlu1 %1387  ;;  %v1487_v39 = vadd.f32 %v3534_v40, %v1465_v0  ;;  %v1451_v28 = vmul.f32 %v2736_v35, %v3716_v19  ;;  %2745 = vrsqrt.f32 %v1672_v37  ;;  %v1650_v47 = vmul.f32 0.03125, %v1626_v24  ;;  %v3953_v19 = vld [vmem:[%s4065_s8] ss:$0 sm:$0xff] }
 0x3aa   : > { %2190 = vst [vmem:[%s3554_s14 + $0xd8] sm:$0xff] %v1734_v62  ;;  %v1468_v48 = vmul.f32 %v3945_v27, %v1446_v13  ;;  %2747 = vrsqrt.f32 %v1413_v18  ;;  %v1405_v16 = vmul.f32 0.03125, %v1388_v32 }
 0x3ab   : > { %v2738_v61 = vpop.eup %2737  ;;  %1503 = vst [vmem:[%s3554_s14 + $0x20] sm:$0xff] %v1487_v39  ;;  %v1473_v15 = vmul.f32 %v3945_v27, %v1451_v28  ;;  %v1666_v40 = vadd.f32 1e-05, %v1650_v47 }
 0x3ac   : > { %v2740_v41 = vpop.eup %2739  ;;  %v1490_v42 = vadd.f32 %v3953_v19, %v1468_v48  ;;  %v1454_v26 = vmul.f32 %v2738_v61, %v3747_v23  ;;  %v1421_v8 = vadd.f32 1e-05, %v1405_v16  ;;  %v1642_v59 = vpop.xlane.xlu0 %1641 }
 0x3ad   : > { %v1620_v17 = vpop.xlane.xlu1 %1619  ;;  %v1495_v63 = vadd.f32 %v3953_v19, %v1473_v15  ;;  %v1693_v2 = vmul.f32 %v2740_v41, %v3728_v9  ;;  %2749 = vrsqrt.f32 %v1666_v40  ;;  %v1658_v30 = vmul.f32 0.03125, %v1642_v59 }
 0x3ae   : > { %1506 = vst [vmem:[%s3554_s14 + $0x38] sm:$0xff] %v1490_v42  ;;  %v1476_v14 = vmul.f32 %v3945_v27, %v1454_v26  ;;  %2751 = vrsqrt.f32 %v1421_v8  ;;  %v1647_v20 = vmul.f32 0.03125, %v1620_v17 }
 0x3af   : > { %v2742_v25 = vpop.eup %2741  ;;  %1511 = vst [vmem:[%s3554_s14 + $0x60] sm:$0xff] %v1495_v63  ;;  %v1709_v57 = vmul.f32 %v3945_v27, %v1693_v2  ;;  %v1674_v23 = vadd.f32 1e-05, %v1658_v30 }
 0x3b0   : > { %v2744_v60 = vpop.eup %2743  ;;  %v1498_v36 = vadd.f32 %v3953_v19, %v1476_v14  ;;  %v1696_v3 = vmul.f32 %v2742_v25, %v3761_v29  ;;  %v1663_v9 = vadd.f32 1e-05, %v1647_v20  ;;  %v1883_v50 = vpop.xlane.xlu0 %1882 }
 0x3b1   : > { %v1636_v21 = vpop.xlane.xlu1 %1635  ;;  %v1725_v53 = vadd.f32 %v3953_v19, %v1709_v57  ;;  %v1701_v10 = vmul.f32 %v2744_v60, %v3744_v58  ;;  %2753 = vrsqrt.f32 %v1674_v23  ;;  %v1899_v34 = vmul.f32 0.03125, %v1883_v50 }
 0x3b2   : > { %1514 = vst [vmem:[%s3554_s14 + $0x78] sm:$0xff] %v1498_v36  ;;  %v1712_v33 = vmul.f32 %v3945_v27, %v1696_v3  ;;  %2755 = vrsqrt.f32 %v1663_v9  ;;  %v1655_v11 = vmul.f32 0.03125, %v1636_v21 }
 0x3b3   : > { %v2746_v5 = vpop.eup %2745  ;;  %2181 = vst [vmem:[%s3554_s14 + $0x90] sm:$0xff] %v1725_v53  ;;  %v1717_v29 = vmul.f32 %v3945_v27, %v1701_v10  ;;  %v1915_v12 = vadd.f32 1e-05, %v1899_v34 }
 0x3b4   : > { %v2748_v43 = vpop.eup %2747  ;;  %v1728_v54 = vadd.f32 %v3953_v19, %v1712_v33  ;;  %v1704_v45 = vmul.f32 %v2746_v5, %v3775_v38  ;;  %v1671_v58 = vadd.f32 1e-05, %v1655_v11 }
 0x3b5   : > { %v1624_v7 = vpop.xlane.xlu1 %1623  ;;  %v1733_v55 = vadd.f32 %v3953_v19, %v1717_v29  ;;  %v1445_v52 = vmul.f32 %v2748_v43, %v3756_v56  ;;  %2757 = vrsqrt.f32 %v1915_v12 }
 0x3b6   : > { %v1649_v0 = vmul.f32 0.03125, %v1624_v7  ;;  %2184 = vst [vmem:[%s3554_s14 + $0xa8] sm:$0xff] %v1728_v54  ;;  %v1720_v37 = vmul.f32 %v3945_v27, %v1704_v45  ;;  %2759 = vrsqrt.f32 %v1671_v58 }
 0x3b7   : > { %v2750_v35 = vpop.eup %2749  ;;  %2189 = vst [vmem:[%s3554_s14 + $0xd0] sm:$0xff] %v1733_v55  ;;  %v1467_v62 = vmul.f32 %v3945_v27, %v1445_v52 }
 0x3b8   : > { %v1665_v13 = vadd.f32 1e-05, %v1649_v0  ;;  %v2752_v38 = vpop.eup %2751  ;;  %v1736_v18 = vadd.f32 %v3953_v19, %v1720_v37  ;;  %v1698_v24 = vmul.f32 %v2750_v35, %v3790_v31 }
 0x3b9   : > { %v1640_v32 = vpop.xlane.xlu1 %1639  ;;  %v1489_v56 = vadd.f32 %v3953_v19, %v1467_v62  ;;  %v1453_v39 = vmul.f32 %v2752_v38, %v3772_v46 }
 0x3ba   : > { %2761 = vrsqrt.f32 %v1665_v13  ;;  %v1657_v28 = vmul.f32 0.03125, %v1640_v32  ;;  %2192 = vst [vmem:[%s3554_s14 + $0xe8] sm:$0xff] %v1736_v18  ;;  %v1714_v47 = vmul.f32 %v3945_v27, %v1698_v24 }
 0x3bb   : > { %v2754_v48 = vpop.eup %2753  ;;  %1505 = vst [vmem:[%s3554_s14 + $0x30] sm:$0xff] %v1489_v56  ;;  %v1475_v16 = vmul.f32 %v3945_v27, %v1453_v39 }
 0x3bc   : > { %v1673_v61 = vadd.f32 1e-05, %v1657_v28  ;;  %v2756_v15 = vpop.eup %2755  ;;  %v1730_v31 = vadd.f32 %v3953_v19, %v1714_v47  ;;  %v1706_v40 = vmul.f32 %v2754_v48, %v3807_v49 }
 0x3bd   : > { %v1881_v41 = vpop.xlane.xlu1 %1880  ;;  %v1497_v46 = vadd.f32 %v3953_v19, %v1475_v16  ;;  %v1695_v42 = vmul.f32 %v2756_v15, %v3785_v22 }
 0x3be   : > { %2763 = vrsqrt.f32 %v1673_v61  ;;  %v1898_v26 = vmul.f32 0.03125, %v1881_v41  ;;  %2186 = vst [vmem:[%s3554_s14 + $0xb8] sm:$0xff] %v1730_v31  ;;  %v1722_v8 = vmul.f32 %v3945_v27, %v1706_v40 }
 0x3bf   : > { %v2758_v59 = vpop.eup %2757  ;;  %1513 = vst [vmem:[%s3554_s14 + $0x70] sm:$0xff] %v1497_v46  ;;  %v1711_v17 = vmul.f32 %v3945_v27, %v1695_v42 }
 0x3c0   : > { %v1914_v63 = vadd.f32 1e-05, %v1898_v26  ;;  %v2760_v2 = vpop.eup %2759  ;;  %v1738_v49 = vadd.f32 %v3953_v19, %v1722_v8  ;;  %v1947_v30 = vmul.f32 %v2758_v59, %v3799_v4 }
 0x3c1   : > { %v1727_v22 = vadd.f32 %v3953_v19, %v1711_v17  ;;  %v1703_v14 = vmul.f32 %v2760_v2, %v3804_v6 }
 0x3c2   : > { %2765 = vrsqrt.f32 %v1914_v63  ;;  %2194 = vst [vmem:[%s3554_s14 + $0xf8] sm:$0xff] %v1738_v49  ;;  %v1963_v20 = vmul.f32 %v3945_v27, %v1947_v30 }
 0x3c3   : > { %2183 = vst [vmem:[%s3554_s14 + $0xa0] sm:$0xff] %v1727_v22  ;;  %v1719_v57 = vmul.f32 %v3945_v27, %v1703_v14 }
 0x3c4   : > { %v2762_v25 = vpop.eup %2761  ;;  %v1979_v23 = vadd.f32 %v3953_v19, %v1963_v20 }
 0x3c5   : > { %v1697_v60 = vmul.f32 %v2762_v25, %v3816_v1  ;;  %v1735_v4 = vadd.f32 %v3953_v19, %v1719_v57 }
 0x3c6   : > { %2210 = vst [vmem:[%s3554_s14 + $0x178] sm:$0xff] %v1979_v23 }
 0x3c7   : > { %v1713_v6 = vmul.f32 %v3945_v27, %v1697_v60  ;;  %2191 = vst [vmem:[%s3554_s14 + $0xe0] sm:$0xff] %v1735_v4 }
 0x3c8   : > { %v2764_v36 = vpop.eup %2763 }
 0x3c9   : > { %v1729_v3 = vadd.f32 %v3953_v19, %v1713_v6  ;;  %v1705_v9 = vmul.f32 %v2764_v36, %v3832_v51 }
 0x3cb   : > { %2185 = vst [vmem:[%s3554_s14 + $0xb0] sm:$0xff] %v1729_v3  ;;  %v1721_v50 = vmul.f32 %v3945_v27, %v1705_v9 }
 0x3cc   : > { %v2766_v21 = vpop.eup %2765 }
 0x3cd   : > { %v1737_v53 = vadd.f32 %v3953_v19, %v1721_v50  ;;  %v1946_v1 = vmul.f32 %v2766_v21, %v3839_v44 }
 0x3cf   : > { %2193 = vst [vmem:[%s3554_s14 + $0xf0] sm:$0xff] %v1737_v53  ;;  %v1962_v10 = vmul.f32 %v3945_v27, %v1946_v1 }
 0x3d1   : > { %v1978_v34 = vadd.f32 %v3953_v19, %v1962_v10 }
 0x3d3   : > { %2209 = vst [vmem:[%s3554_s14 + $0x170] sm:$0xff] %v1978_v34 }
 0x3d4   : > { %s2215_s11 = sshll.u32 %s2952_s13, 11  ;;  %s2027_s15 = sshll.u32 %s3554_s14, 4  ;;  %s2028_s15 = int_to_ptr.vmem [resolvable:$true] %s2027_s15 }
 0x3d5   : > { %s2010_s26 = scalar_lea.hbm %s4066_s9, %s2215_s11  ;;  %s2874_s27 = smov 2048  }
 0x3d6   : > { %p4113_p12 = scmp.ne.s32.totalorder %s4086_s19, 0  ;;  %s2875_s21 = smov 4096  }
 0x3d7   : > { %s2876_s28 = smov 16   ;;  %s2877_s29 = smov 128  }
 0x3d8   : > { %2601 = sst [smem:[#allocation9]] (%p4113_p12), %s2874_s27  ;;  %s2878_s13 = smov 8  }
 0x3d9   : > { %2602 = sst [smem:[#allocation9 + $0x1]] (%p4113_p12), %s2875_s21  ;;  %s2879_s14 = smov [#allocation8]  }
 0x3da   : > { %2603 = sst [smem:[#allocation9 + $0x2]] (%p4113_p12), %s2876_s28  ;;  %s2880_s16 = smov 0  }
 0x3db   : > { %2604 = sst [smem:[#allocation9 + $0x3]] (%p4113_p12), %s2877_s29 }
 0x3dc   : > { %2605 = sst [smem:[#allocation9 + $0x4]] (%p4113_p12), %s2877_s29 }
 0x3dd   : > { %2606 = sst [smem:[#allocation9 + $0x5]] (%p4113_p12), %s2878_s13 }
 0x3de   : > { %2607 = dma.general (%p4113_p12), %s2028_s15, 6144, %s2010_s26, %s1998_s23, %s2879_s14, [#allocation9], %s2880_s16, 0  }
 0x3df PF: > { %p2624_p1 = scmp.ge.s32.totalorder %s2867_s12, 2  ;;  %s2055_s17 = sand.u32 1, %s2855_s30  }
 0x3e0   : > { %p4114_p2 = scmp.ne.s32.totalorder %s4087_s20, 0  ;;  %s2056_s22 = scalar_lea.sflag [#allocation4], %s2055_s17 }
 0x3e2   : > { %p2617_p3 = pnand %p2624_p1, %p4114_p2 }
 0x3e4   : > { %2850 = dma.done.wait (!%p2617_p3), %s2056_s22, 6144  }
 0x3e5   : > { %2852 = vsyncadd (!%p2617_p3), %s2056_s22, 4294961152  ;;  %s4115_s12 = sld [smem:[#allocation14_spill]]  ;;  %s4116_s25 = sld [smem:[#allocation13_spill]] }
 0x3e6   : > { %s4117_s11 = sld [smem:[#allocation15_spill]]  ;;  %s4118_s30 = smov %s2859_s10 }
 0x3eb   : > { %p21_p4 = scmp.ge.s32.totalorder %s4115_s12, 4   ;;  %s4119_s10 = smov %s4116_s25 }
 0x3ed   :  { %23 = sbr.rel (!%p21_p4) target bundleno = 5 (0x5), region = 116 }
 0x3f4   :  { %2061 = vsyncpa [#allocation3], 1 }
 0x3f5   :  { %2063 = vsyncpa [#allocation3 + $0x1], 1 }
 0x3f6   :  { %2064 = vsyncpa [#allocation6], 1 }
 0x3f7   :  { %2065 = vsyncpa [#allocation4], 1 }
 0x3f8   :  { %2067 = vsyncpa [#allocation4 + $0x1], 1 }

</bundles_post_ra>
